<compile_context>
chip_gen: v5e
topology: v5e:2x2
jax: 0.10.0
libtpu: 0.0.40
codegen_flags: <defaults>
</compile_context>

<pallas_src>
import jax
import jax.numpy as jnp
from jax import lax
from jax.experimental import pallas as pl
from jax.experimental.pallas import tpu as pltpu


INPUT_SHAPE = 32      # fc1 in_features
FC1_DIM = 64          # fc1 out_features / GRU input size
FC1_PAD = 128         # fc1 width padded to a full lane tile
HIDDEN_DIM = 128      # rnn_hidden_dim
OUTPUT_SHAPE = 16     # fc2 out_features


def rnn_kernel(x_ref, w1_ref, b1_ref, wih_ref, bih_ref, whh_ref, bhhn_ref,
               w2_ref, b2_ref, h0_ref, out_ref, hn_ref, gx_ref, hs_ref):
    """Full forward: fc1+relu -> GRU over time -> fc2.

    x_ref:   (T*Bp, Din)        time-major, batch padded to Bp, flattened
    w1_ref:  (Din, 128)         b1_ref:  (1, 128)   (cols 64: are zero pad)
    wih_ref: (128, 3H)          bih_ref: (1, 3H)    (bhh r/z already folded in)
    whh_ref: (H, 3H)            bhhn_ref:(1, H)     (n-gate hidden bias only)
    w2_ref:  (H, Opad)          b2_ref:  (1, Opad)
    h0_ref:  (Bp, H)
    out_ref: (T*Bp, Opad)       hn_ref:  (Bp, H)
    gx_ref:  (T*Bp, 3H) scratch hs_ref:  (T*Bp, H) scratch
    """
    TB = x_ref.shape[0]
    Bp, H = h0_ref.shape
    T = TB // Bp

    # fc1 + ReLU for all time steps at once: (T*Bp, Din) @ (Din, 128),
    # lane-dense 128-wide intermediate (padded cols are exact zeros).
    xf = jnp.maximum(
        jnp.dot(x_ref[...], w1_ref[...], preferred_element_type=jnp.float32)
        + b1_ref[...],
        0.0,
    )

    # Input contribution to all three gates (r/z hidden biases pre-folded),
    # one big (T*Bp, 128) @ (128, 3H) matmul, stored to VMEM scratch.
    gx_ref[...] = (
        jnp.dot(xf, wih_ref[...], preferred_element_type=jnp.float32)
        + bih_ref[...]
    )

    # Hoisted loop-invariants: weight load and the n-gate bias broadcast
    # (JAX does not CSE broadcast_in_dim across unrolled iterations).
    whh = whh_ref[...]                                     # (H, 3H)
    bhhn = jnp.broadcast_to(bhhn_ref[...], (Bp, H))        # (Bp, H)

    def step(t, h):
        row = pl.multiple_of(t * Bp, Bp)                   # sublane-aligned
        gh = jnp.dot(h, whh, preferred_element_type=jnp.float32)   # (Bp, 3H)
        gxt = gx_ref[pl.ds(row, Bp), :]                             # (Bp, 3H)
        # One sigmoid over the contiguous r|z slab (single EUP push/pop).
        rz = jax.nn.sigmoid(gxt[:, 0:2 * H] + gh[:, 0:2 * H])
        r = rz[:, 0:H]
        z = rz[:, H:2 * H]
        n = jnp.tanh(gxt[:, 2 * H:3 * H] + r * (gh[:, 2 * H:3 * H] + bhhn))
        h_new = n + z * (h - n)                            # == (1-z)*n + z*h
        hs_ref[pl.ds(row, Bp), :] = h_new
        return h_new

    # Short fixed trip count -> unrolled (bounded for longer sequences).
    h_last = lax.fori_loop(0, T, step, h0_ref[...], unroll=min(T, 8))
    hn_ref[...] = h_last

    # fc2 over every hidden state: (T*Bp, H) @ (H, Opad), lane-dense store.
    out_ref[...] = (
        jnp.dot(hs_ref[...], w2_ref[...], preferred_element_type=jnp.float32)
        + b2_ref[...]
    )


def _round_up(x, m):
    return ((x + m - 1) // m) * m


def _vmem_cap_bytes():
    try:
        return int(pltpu.get_tpu_info().vmem_capacity_bytes)
    except Exception:
        return 64 << 20          # conservative (v7x-class) fallback


@jax.jit
def rnn_forward(params, inputs, state):
    """inputs: (B, T, input_shape); state: (1, B, H)  (PyTorch convention)."""
    B, T, Din = inputs.shape
    H = params["whh"].shape[1]
    O = params["w2"].shape[0]
    Bp = _round_up(B, 8)          # pad batch onto full sublanes
    Opad = _round_up(O, 128)      # lane-dense fc2 output

    # Time-major, batch-padded, flattened input: (T*Bp, Din).
    x_tm = jnp.transpose(inputs, (1, 0, 2))                      # (T, B, Din)
    x_tm = jnp.pad(x_tm, ((0, 0), (0, Bp - B), (0, 0)))
    x_flat = x_tm.reshape(T * Bp, Din)

    h0 = jnp.pad(state[0], ((0, Bp - B), (0, 0)))                # (Bp, H)

    # Pre-transposed (K, N) weights; pad the fc1 width to 128 lanes (exact
    # zeros, so relu/gx results are unchanged); fold bhh_r / bhh_z into the
    # input-side gate bias.
    w1t = jnp.pad(params["w1"].T, ((0, 0), (0, FC1_PAD - FC1_DIM)))  # (Din,128)
    b1 = jnp.pad(params["b1"].reshape(1, -1),
                 ((0, 0), (0, FC1_PAD - FC1_DIM)))                   # (1, 128)
    wih_t = jnp.pad(params["wih"].T,
                    ((0, FC1_PAD - FC1_DIM), (0, 0)))                # (128, 3H)
    bhh = params["bhh"].reshape(1, -1)
    bih_f = (params["bih"].reshape(1, -1)
             + jnp.concatenate(
                 [bhh[:, :2 * H], jnp.zeros((1, H), jnp.float32)], axis=1))
    whh_t = params["whh"].T                                          # (H, 3H)
    bhh_n = bhh[:, 2 * H:]                                           # (1, H)
    w2t = jnp.pad(params["w2"].T, ((0, 0), (0, Opad - O)))           # (H, Opad)
    b2p = jnp.pad(params["b2"].reshape(1, -1), ((0, 0), (0, Opad - O)))

    # VMEM footprint (activations + scratch + weights), with margin, capped
    # against the actual chip VMEM (64 MiB on v7x, 128 MiB on v5e/v6e).
    fbytes = 4
    footprint = fbytes * (
        T * Bp * (Din + FC1_PAD + 4 * H + Opad)      # x, xf, gx, hs, out
        + Din * FC1_PAD + FC1_PAD * 3 * H + H * 3 * H + H * Opad
        + 2 * Bp * H + 4 * H + FC1_PAD + Opad
    )
    vmem_cap = _vmem_cap_bytes()
    vmem_limit = int(min(max(2 * footprint + (8 << 20), 32 << 20),
                         int(0.6 * vmem_cap)))
    # TODO(synk): for large T*Bp, tile gx/hs over T (grid / emit_pipeline)
    # instead of keeping everything resident.

    vmem = pl.BlockSpec(memory_space=pltpu.MemorySpace.VMEM)
    out_flat, h_n = pl.pallas_call(
        rnn_kernel,
        out_shape=(
            jax.ShapeDtypeStruct((T * Bp, Opad), jnp.float32),
            jax.ShapeDtypeStruct((Bp, H), jnp.float32),
        ),
        in_specs=[vmem] * 10,
        out_specs=(vmem, vmem),
        scratch_shapes=[
            pltpu.VMEM((T * Bp, 3 * H), jnp.float32),   # gx
            pltpu.VMEM((T * Bp, H), jnp.float32),       # per-step hidden states
        ],
        compiler_params=pltpu.CompilerParams(vmem_limit_bytes=vmem_limit),
    )(x_flat, w1t, b1, wih_t, bih_f, whh_t, bhh_n, w2t, b2p, h0)

    out = out_flat.reshape(T, Bp, Opad)[:, :B, :O]                # (T, B, O)
    output = jnp.transpose(out, (1, 0, 2))                        # (B, T, O)
    return output, h_n[None, :B, :]                               # (1, B, H)


def init_params(key, input_shape, output_shape, hidden_dim):
    """Deterministic init mirroring PyTorch's U(-1/sqrt(fan_in), 1/sqrt(fan_in))."""
    ks = jax.random.split(key, 9)

    def u(k, shape, fan_in):
        bound = 1.0 / jnp.sqrt(float(fan_in))
        return jax.random.uniform(k, shape, jnp.float32, -bound, bound)

    return {
        "w1":  u(ks[0], (FC1_DIM, input_shape), input_shape),
        "b1":  u(ks[1], (1, FC1_DIM), input_shape),
        "wih": u(ks[2], (3 * hidden_dim, FC1_DIM), hidden_dim),
        "bih": u(ks[3], (1, 3 * hidden_dim), hidden_dim),
        "whh": u(ks[4], (3 * hidden_dim, hidden_dim), hidden_dim),
        "bhh": u(ks[5], (1, 3 * hidden_dim), hidden_dim),
        "w2":  u(ks[6], (output_shape, hidden_dim), hidden_dim),
        "b2":  u(ks[7], (1, output_shape), hidden_dim),
    }


def rnn_forward_ref(params, inputs, state):
    """Pure-JAX reference with identical semantics (for verification)."""
    H = params["whh"].shape[1]
    x = jax.nn.relu(inputs @ params["w1"].T + params["b1"][0])
    gx = x @ params["wih"].T + params["bih"][0]        # (B, T, 3H)

    def step(h, gxt):
        gh = h @ params["whh"].T + params["bhh"][0]
        r = jax.nn.sigmoid(gxt[:, :H] + gh[:, :H])
        z = jax.nn.sigmoid(gxt[:, H:2 * H] + gh[:, H:2 * H])
        n = jnp.tanh(gxt[:, 2 * H:] + r * gh[:, 2 * H:])
        h_new = (1.0 - z) * n + z * h
        return h_new, h_new

    h_last, hs = lax.scan(step, state[0], jnp.transpose(gx, (1, 0, 2)))
    hs = jnp.transpose(hs, (1, 0, 2))                  # (B, T, H)
    out = hs @ params["w2"].T + params["b2"][0]
    return out, h_last[None]


if __name__ == "__main__":
    B, T = 2, 8
    key = jax.random.PRNGKey(0)
    k_param, k_x = jax.random.split(key)

    params = init_params(k_param, INPUT_SHAPE, OUTPUT_SHAPE, HIDDEN_DIM)
    x = jax.random.normal(k_x, (B, T, INPUT_SHAPE), jnp.float32)
    state0 = jnp.zeros((1, B, HIDDEN_DIM), jnp.float32)   # get_initial_hidden

    out, state = rnn_forward(params, x, state0)
    out, state = jax.block_until_ready(out), jax.block_until_ready(state)

    # Sanity-check against pure-JAX reference.
    out_ref, state_ref = rnn_forward_ref(params, x, state0)
    assert out.shape == (B, T, OUTPUT_SHAPE)
    assert state.shape == (1, B, HIDDEN_DIM)
    assert jnp.allclose(out, out_ref, atol=1e-4, rtol=1e-4)
    assert jnp.allclose(state, state_ref, atol=1e-4, rtol=1e-4)

    print("KERNEL_OK")
</pallas_src>

<mosaic_0001>
module attributes {stable_mosaic.version = 11 : i64} {
  func.func @rnn_kernel(%arg0: memref<64x32xf32, #tpu.memory_space<vmem>>, %arg1: memref<32x128xf32, #tpu.memory_space<vmem>>, %arg2: memref<1x128xf32, #tpu.memory_space<vmem>>, %arg3: memref<128x384xf32, #tpu.memory_space<vmem>>, %arg4: memref<1x384xf32, #tpu.memory_space<vmem>>, %arg5: memref<128x384xf32, #tpu.memory_space<vmem>>, %arg6: memref<1x128xf32, #tpu.memory_space<vmem>>, %arg7: memref<128x128xf32, #tpu.memory_space<vmem>>, %arg8: memref<1x128xf32, #tpu.memory_space<vmem>>, %arg9: memref<8x128xf32, #tpu.memory_space<vmem>>, %arg10: memref<64x128xf32, #tpu.memory_space<vmem>>, %arg11: memref<8x128xf32, #tpu.memory_space<vmem>>, %arg12: memref<64x384xf32, #tpu.memory_space<vmem>>, %arg13: memref<64x128xf32, #tpu.memory_space<vmem>>) attributes {dimension_semantics = [], scalar_prefetch = 0 : i64, scratch_operands = 2 : i64, tpu.core_type = #tpu.core_type<tc>} {
    %c0 = arith.constant 0 : index
    %c0_0 = arith.constant 0 : index
    %0 = vector.load %arg0[%c0, %c0_0] : memref<64x32xf32, #tpu.memory_space<vmem>>, vector<64x32xf32>
    %c0_1 = arith.constant 0 : index
    %c0_2 = arith.constant 0 : index
    %1 = vector.load %arg1[%c0_1, %c0_2] : memref<32x128xf32, #tpu.memory_space<vmem>>, vector<32x128xf32>
    %cst = arith.constant dense<0.000000e+00> : vector<64x128xf32>
    %2 = tpu.matmul %0, %1, %cst {dimension_numbers = #tpu.dot_dimension_numbers<[1], [0], [0], [1], [0, 0, 1, 1], [], []>} : vector<64x32xf32>, vector<32x128xf32>, vector<64x128xf32> -> vector<64x128xf32>
    %c0_3 = arith.constant 0 : index
    %c0_4 = arith.constant 0 : index
    %3 = vector.load %arg2[%c0_3, %c0_4] : memref<1x128xf32, #tpu.memory_space<vmem>>, vector<1x128xf32>
    %4 = vector.broadcast %3 : vector<1x128xf32> to vector<64x128xf32>
    %5 = arith.addf %2, %4 : vector<64x128xf32>
    %cst_5 = arith.constant 0.000000e+00 : f32
    %6 = vector.broadcast %cst_5 : f32 to vector<64x128xf32>
    %7 = arith.maximumf %5, %6 : vector<64x128xf32>
    %c0_6 = arith.constant 0 : index
    %c0_7 = arith.constant 0 : index
    %8 = vector.load %arg3[%c0_6, %c0_7] : memref<128x384xf32, #tpu.memory_space<vmem>>, vector<128x384xf32>
    %cst_8 = arith.constant dense<0.000000e+00> : vector<64x384xf32>
    %9 = tpu.matmul %7, %8, %cst_8 {dimension_numbers = #tpu.dot_dimension_numbers<[1], [0], [0], [1], [0, 0, 1, 1], [], []>} : vector<64x128xf32>, vector<128x384xf32>, vector<64x384xf32> -> vector<64x384xf32>
    %c0_9 = arith.constant 0 : index
    %c0_10 = arith.constant 0 : index
    %10 = vector.load %arg4[%c0_9, %c0_10] : memref<1x384xf32, #tpu.memory_space<vmem>>, vector<1x384xf32>
    %11 = vector.broadcast %10 : vector<1x384xf32> to vector<64x384xf32>
    %12 = arith.addf %9, %11 : vector<64x384xf32>
    %c0_11 = arith.constant 0 : index
    %c0_12 = arith.constant 0 : index
    %13 = vector.load %arg12[%c0_11, %c0_12] : memref<64x384xf32, #tpu.memory_space<vmem>>, vector<64x384xf32>
    tpu.vector_store %arg12[%c0_11, %c0_12], %12 {strides = array<i32>} : memref<64x384xf32, #tpu.memory_space<vmem>>, vector<64x384xf32>,
    %c0_13 = arith.constant 0 : index
    %c0_14 = arith.constant 0 : index
    %14 = vector.load %arg5[%c0_13, %c0_14] : memref<128x384xf32, #tpu.memory_space<vmem>>, vector<128x384xf32>
    %c0_15 = arith.constant 0 : index
    %c0_16 = arith.constant 0 : index
    %15 = vector.load %arg6[%c0_15, %c0_16] : memref<1x128xf32, #tpu.memory_space<vmem>>, vector<1x128xf32>
    %16 = vector.shape_cast %15 : vector<1x128xf32> to vector<1x128xf32>
    %17 = vector.broadcast %16 : vector<1x128xf32> to vector<8x128xf32>
    %c0_17 = arith.constant 0 : index
    %c0_18 = arith.constant 0 : index
    %18 = vector.load %arg9[%c0_17, %c0_18] : memref<8x128xf32, #tpu.memory_space<vmem>>, vector<8x128xf32>
    %c0_i32 = arith.constant 0 : i32
    %c8_i32 = arith.constant 8 : i32
    %19 = arith.muli %c0_i32, %c8_i32 : i32
    %20 = tpu.assume_multiple %19, 8 : i32
    %cst_19 = arith.constant dense<0.000000e+00> : vector<8x384xf32>
    %21 = tpu.matmul %18, %14, %cst_19 {dimension_numbers = #tpu.dot_dimension_numbers<[1], [0], [0], [1], [0, 0, 1, 1], [], []>} : vector<8x128xf32>, vector<128x384xf32>, vector<8x384xf32> -> vector<8x384xf32>
    %22 = arith.index_cast %20 : i32 to index
    %c0_20 = arith.constant 0 : index
    %23 = vector.load %arg12[%22, %c0_20] : memref<64x384xf32, #tpu.memory_space<vmem>>, vector<8x384xf32>
    %24 = vector.extract_strided_slice %23 {offsets = [0, 0], sizes = [8, 256], strides = [1, 1]} : vector<8x384xf32> to vector<8x256xf32>
    %25 = vector.extract_strided_slice %21 {offsets = [0, 0], sizes = [8, 256], strides = [1, 1]} : vector<8x384xf32> to vector<8x256xf32>
    %26 = arith.addf %24, %25 : vector<8x256xf32>
    %27 = arith.negf %26 : vector<8x256xf32>
    %28 = math.exp %27 : vector<8x256xf32>
    %cst_21 = arith.constant 1.000000e+00 : f32
    %29 = vector.broadcast %cst_21 : f32 to vector<8x256xf32>
    %30 = arith.addf %29, %28 : vector<8x256xf32>
    %31 = arith.divf %29, %30 : vector<8x256xf32>
    %32 = vector.extract_strided_slice %31 {offsets = [0, 0], sizes = [8, 128], strides = [1, 1]} : vector<8x256xf32> to vector<8x128xf32>
    %33 = vector.extract_strided_slice %31 {offsets = [0, 128], sizes = [8, 128], strides = [1, 1]} : vector<8x256xf32> to vector<8x128xf32>
    %34 = vector.extract_strided_slice %23 {offsets = [0, 256], sizes = [8, 128], strides = [1, 1]} : vector<8x384xf32> to vector<8x128xf32>
    %35 = vector.extract_strided_slice %21 {offsets = [0, 256], sizes = [8, 128], strides = [1, 1]} : vector<8x384xf32> to vector<8x128xf32>
    %36 = arith.addf %35, %17 : vector<8x128xf32>
    %37 = arith.mulf %32, %36 : vector<8x128xf32>
    %38 = arith.addf %34, %37 : vector<8x128xf32>
    %39 = math.tanh %38 : vector<8x128xf32>
    %40 = arith.subf %18, %39 : vector<8x128xf32>
    %41 = arith.mulf %33, %40 : vector<8x128xf32>
    %42 = arith.addf %39, %41 : vector<8x128xf32>
    %43 = arith.index_cast %20 : i32 to index
    %c0_22 = arith.constant 0 : index
    %44 = vector.load %arg13[%43, %c0_22] : memref<64x128xf32, #tpu.memory_space<vmem>>, vector<8x128xf32>
    tpu.vector_store %arg13[%43, %c0_22], %42 {strides = array<i32>} : memref<64x128xf32, #tpu.memory_space<vmem>>, vector<8x128xf32>,
    %c1_i32 = arith.constant 1 : i32
    %c8_i32_23 = arith.constant 8 : i32
    %45 = arith.muli %c1_i32, %c8_i32_23 : i32
    %46 = tpu.assume_multiple %45, 8 : i32
    %cst_24 = arith.constant dense<0.000000e+00> : vector<8x384xf32>
    %47 = tpu.matmul %42, %14, %cst_24 {dimension_numbers = #tpu.dot_dimension_numbers<[1], [0], [0], [1], [0, 0, 1, 1], [], []>} : vector<8x128xf32>, vector<128x384xf32>, vector<8x384xf32> -> vector<8x384xf32>
    %48 = arith.index_cast %46 : i32 to index
    %c0_25 = arith.constant 0 : index
    %49 = vector.load %arg12[%48, %c0_25] : memref<64x384xf32, #tpu.memory_space<vmem>>, vector<8x384xf32>
    %50 = vector.extract_strided_slice %49 {offsets = [0, 0], sizes = [8, 256], strides = [1, 1]} : vector<8x384xf32> to vector<8x256xf32>
    %51 = vector.extract_strided_slice %47 {offsets = [0, 0], sizes = [8, 256], strides = [1, 1]} : vector<8x384xf32> to vector<8x256xf32>
    %52 = arith.addf %50, %51 : vector<8x256xf32>
    %53 = arith.negf %52 : vector<8x256xf32>
    %54 = math.exp %53 : vector<8x256xf32>
    %cst_26 = arith.constant 1.000000e+00 : f32
    %55 = vector.broadcast %cst_26 : f32 to vector<8x256xf32>
    %56 = arith.addf %55, %54 : vector<8x256xf32>
    %57 = arith.divf %55, %56 : vector<8x256xf32>
    %58 = vector.extract_strided_slice %57 {offsets = [0, 0], sizes = [8, 128], strides = [1, 1]} : vector<8x256xf32> to vector<8x128xf32>
    %59 = vector.extract_strided_slice %57 {offsets = [0, 128], sizes = [8, 128], strides = [1, 1]} : vector<8x256xf32> to vector<8x128xf32>
    %60 = vector.extract_strided_slice %49 {offsets = [0, 256], sizes = [8, 128], strides = [1, 1]} : vector<8x384xf32> to vector<8x128xf32>
    %61 = vector.extract_strided_slice %47 {offsets = [0, 256], sizes = [8, 128], strides = [1, 1]} : vector<8x384xf32> to vector<8x128xf32>
    %62 = arith.addf %61, %17 : vector<8x128xf32>
    %63 = arith.mulf %58, %62 : vector<8x128xf32>
    %64 = arith.addf %60, %63 : vector<8x128xf32>
    %65 = math.tanh %64 : vector<8x128xf32>
    %66 = arith.subf %42, %65 : vector<8x128xf32>
    %67 = arith.mulf %59, %66 : vector<8x128xf32>
    %68 = arith.addf %65, %67 : vector<8x128xf32>
    %69 = arith.index_cast %46 : i32 to index
    %c0_27 = arith.constant 0 : index
    %70 = vector.load %arg13[%69, %c0_27] : memref<64x128xf32, #tpu.memory_space<vmem>>, vector<8x128xf32>
    tpu.vector_store %arg13[%69, %c0_27], %68 {strides = array<i32>} : memref<64x128xf32, #tpu.memory_space<vmem>>, vector<8x128xf32>,
    %c2_i32 = arith.constant 2 : i32
    %c8_i32_28 = arith.constant 8 : i32
    %71 = arith.muli %c2_i32, %c8_i32_28 : i32
    %72 = tpu.assume_multiple %71, 8 : i32
    %cst_29 = arith.constant dense<0.000000e+00> : vector<8x384xf32>
    %73 = tpu.matmul %68, %14, %cst_29 {dimension_numbers = #tpu.dot_dimension_numbers<[1], [0], [0], [1], [0, 0, 1, 1], [], []>} : vector<8x128xf32>, vector<128x384xf32>, vector<8x384xf32> -> vector<8x384xf32>
    %74 = arith.index_cast %72 : i32 to index
    %c0_30 = arith.constant 0 : index
    %75 = vector.load %arg12[%74, %c0_30] : memref<64x384xf32, #tpu.memory_space<vmem>>, vector<8x384xf32>
    %76 = vector.extract_strided_slice %75 {offsets = [0, 0], sizes = [8, 256], strides = [1, 1]} : vector<8x384xf32> to vector<8x256xf32>
    %77 = vector.extract_strided_slice %73 {offsets = [0, 0], sizes = [8, 256], strides = [1, 1]} : vector<8x384xf32> to vector<8x256xf32>
    %78 = arith.addf %76, %77 : vector<8x256xf32>
    %79 = arith.negf %78 : vector<8x256xf32>
    %80 = math.exp %79 : vector<8x256xf32>
    %cst_31 = arith.constant 1.000000e+00 : f32
    %81 = vector.broadcast %cst_31 : f32 to vector<8x256xf32>
    %82 = arith.addf %81, %80 : vector<8x256xf32>
    %83 = arith.divf %81, %82 : vector<8x256xf32>
    %84 = vector.extract_strided_slice %83 {offsets = [0, 0], sizes = [8, 128], strides = [1, 1]} : vector<8x256xf32> to vector<8x128xf32>
    %85 = vector.extract_strided_slice %83 {offsets = [0, 128], sizes = [8, 128], strides = [1, 1]} : vector<8x256xf32> to vector<8x128xf32>
    %86 = vector.extract_strided_slice %75 {offsets = [0, 256], sizes = [8, 128], strides = [1, 1]} : vector<8x384xf32> to vector<8x128xf32>
    %87 = vector.extract_strided_slice %73 {offsets = [0, 256], sizes = [8, 128], strides = [1, 1]} : vector<8x384xf32> to vector<8x128xf32>
    %88 = arith.addf %87, %17 : vector<8x128xf32>
    %89 = arith.mulf %84, %88 : vector<8x128xf32>
    %90 = arith.addf %86, %89 : vector<8x128xf32>
    %91 = math.tanh %90 : vector<8x128xf32>
    %92 = arith.subf %68, %91 : vector<8x128xf32>
    %93 = arith.mulf %85, %92 : vector<8x128xf32>
    %94 = arith.addf %91, %93 : vector<8x128xf32>
    %95 = arith.index_cast %72 : i32 to index
    %c0_32 = arith.constant 0 : index
    %96 = vector.load %arg13[%95, %c0_32] : memref<64x128xf32, #tpu.memory_space<vmem>>, vector<8x128xf32>
    tpu.vector_store %arg13[%95, %c0_32], %94 {strides = array<i32>} : memref<64x128xf32, #tpu.memory_space<vmem>>, vector<8x128xf32>,
    %c3_i32 = arith.constant 3 : i32
    %c8_i32_33 = arith.constant 8 : i32
    %97 = arith.muli %c3_i32, %c8_i32_33 : i32
    %98 = tpu.assume_multiple %97, 8 : i32
    %cst_34 = arith.constant dense<0.000000e+00> : vector<8x384xf32>
    %99 = tpu.matmul %94, %14, %cst_34 {dimension_numbers = #tpu.dot_dimension_numbers<[1], [0], [0], [1], [0, 0, 1, 1], [], []>} : vector<8x128xf32>, vector<128x384xf32>, vector<8x384xf32> -> vector<8x384xf32>
    %100 = arith.index_cast %98 : i32 to index
    %c0_35 = arith.constant 0 : index
    %101 = vector.load %arg12[%100, %c0_35] : memref<64x384xf32, #tpu.memory_space<vmem>>, vector<8x384xf32>
    %102 = vector.extract_strided_slice %101 {offsets = [0, 0], sizes = [8, 256], strides = [1, 1]} : vector<8x384xf32> to vector<8x256xf32>
    %103 = vector.extract_strided_slice %99 {offsets = [0, 0], sizes = [8, 256], strides = [1, 1]} : vector<8x384xf32> to vector<8x256xf32>
    %104 = arith.addf %102, %103 : vector<8x256xf32>
    %105 = arith.negf %104 : vector<8x256xf32>
    %106 = math.exp %105 : vector<8x256xf32>
    %cst_36 = arith.constant 1.000000e+00 : f32
    %107 = vector.broadcast %cst_36 : f32 to vector<8x256xf32>
    %108 = arith.addf %107, %106 : vector<8x256xf32>
    %109 = arith.divf %107, %108 : vector<8x256xf32>
    %110 = vector.extract_strided_slice %109 {offsets = [0, 0], sizes = [8, 128], strides = [1, 1]} : vector<8x256xf32> to vector<8x128xf32>
    %111 = vector.extract_strided_slice %109 {offsets = [0, 128], sizes = [8, 128], strides = [1, 1]} : vector<8x256xf32> to vector<8x128xf32>
    %112 = vector.extract_strided_slice %101 {offsets = [0, 256], sizes = [8, 128], strides = [1, 1]} : vector<8x384xf32> to vector<8x128xf32>
    %113 = vector.extract_strided_slice %99 {offsets = [0, 256], sizes = [8, 128], strides = [1, 1]} : vector<8x384xf32> to vector<8x128xf32>
    %114 = arith.addf %113, %17 : vector<8x128xf32>
    %115 = arith.mulf %110, %114 : vector<8x128xf32>
    %116 = arith.addf %112, %115 : vector<8x128xf32>
    %117 = math.tanh %116 : vector<8x128xf32>
    %118 = arith.subf %94, %117 : vector<8x128xf32>
    %119 = arith.mulf %111, %118 : vector<8x128xf32>
    %120 = arith.addf %117, %119 : vector<8x128xf32>
    %121 = arith.index_cast %98 : i32 to index
    %c0_37 = arith.constant 0 : index
    %122 = vector.load %arg13[%121, %c0_37] : memref<64x128xf32, #tpu.memory_space<vmem>>, vector<8x128xf32>
    tpu.vector_store %arg13[%121, %c0_37], %120 {strides = array<i32>} : memref<64x128xf32, #tpu.memory_space<vmem>>, vector<8x128xf32>,
    %c4_i32 = arith.constant 4 : i32
    %c8_i32_38 = arith.constant 8 : i32
    %123 = arith.muli %c4_i32, %c8_i32_38 : i32
    %124 = tpu.assume_multiple %123, 8 : i32
    %cst_39 = arith.constant dense<0.000000e+00> : vector<8x384xf32>
    %125 = tpu.matmul %120, %14, %cst_39 {dimension_numbers = #tpu.dot_dimension_numbers<[1], [0], [0], [1], [0, 0, 1, 1], [], []>} : vector<8x128xf32>, vector<128x384xf32>, vector<8x384xf32> -> vector<8x384xf32>
    %126 = arith.index_cast %124 : i32 to index
    %c0_40 = arith.constant 0 : index
    %127 = vector.load %arg12[%126, %c0_40] : memref<64x384xf32, #tpu.memory_space<vmem>>, vector<8x384xf32>
    %128 = vector.extract_strided_slice %127 {offsets = [0, 0], sizes = [8, 256], strides = [1, 1]} : vector<8x384xf32> to vector<8x256xf32>
    %129 = vector.extract_strided_slice %125 {offsets = [0, 0], sizes = [8, 256], strides = [1, 1]} : vector<8x384xf32> to vector<8x256xf32>
    %130 = arith.addf %128, %129 : vector<8x256xf32>
    %131 = arith.negf %130 : vector<8x256xf32>
    %132 = math.exp %131 : vector<8x256xf32>
    %cst_41 = arith.constant 1.000000e+00 : f32
    %133 = vector.broadcast %cst_41 : f32 to vector<8x256xf32>
    %134 = arith.addf %133, %132 : vector<8x256xf32>
    %135 = arith.divf %133, %134 : vector<8x256xf32>
    %136 = vector.extract_strided_slice %135 {offsets = [0, 0], sizes = [8, 128], strides = [1, 1]} : vector<8x256xf32> to vector<8x128xf32>
    %137 = vector.extract_strided_slice %135 {offsets = [0, 128], sizes = [8, 128], strides = [1, 1]} : vector<8x256xf32> to vector<8x128xf32>
    %138 = vector.extract_strided_slice %127 {offsets = [0, 256], sizes = [8, 128], strides = [1, 1]} : vector<8x384xf32> to vector<8x128xf32>
    %139 = vector.extract_strided_slice %125 {offsets = [0, 256], sizes = [8, 128], strides = [1, 1]} : vector<8x384xf32> to vector<8x128xf32>
    %140 = arith.addf %139, %17 : vector<8x128xf32>
    %141 = arith.mulf %136, %140 : vector<8x128xf32>
    %142 = arith.addf %138, %141 : vector<8x128xf32>
    %143 = math.tanh %142 : vector<8x128xf32>
    %144 = arith.subf %120, %143 : vector<8x128xf32>
    %145 = arith.mulf %137, %144 : vector<8x128xf32>
    %146 = arith.addf %143, %145 : vector<8x128xf32>
    %147 = arith.index_cast %124 : i32 to index
    %c0_42 = arith.constant 0 : index
    %148 = vector.load %arg13[%147, %c0_42] : memref<64x128xf32, #tpu.memory_space<vmem>>, vector<8x128xf32>
    tpu.vector_store %arg13[%147, %c0_42], %146 {strides = array<i32>} : memref<64x128xf32, #tpu.memory_space<vmem>>, vector<8x128xf32>,
    %c5_i32 = arith.constant 5 : i32
    %c8_i32_43 = arith.constant 8 : i32
    %149 = arith.muli %c5_i32, %c8_i32_43 : i32
    %150 = tpu.assume_multiple %149, 8 : i32
    %cst_44 = arith.constant dense<0.000000e+00> : vector<8x384xf32>
    %151 = tpu.matmul %146, %14, %cst_44 {dimension_numbers = #tpu.dot_dimension_numbers<[1], [0], [0], [1], [0, 0, 1, 1], [], []>} : vector<8x128xf32>, vector<128x384xf32>, vector<8x384xf32> -> vector<8x384xf32>
    %152 = arith.index_cast %150 : i32 to index
    %c0_45 = arith.constant 0 : index
    %153 = vector.load %arg12[%152, %c0_45] : memref<64x384xf32, #tpu.memory_space<vmem>>, vector<8x384xf32>
    %154 = vector.extract_strided_slice %153 {offsets = [0, 0], sizes = [8, 256], strides = [1, 1]} : vector<8x384xf32> to vector<8x256xf32>
    %155 = vector.extract_strided_slice %151 {offsets = [0, 0], sizes = [8, 256], strides = [1, 1]} : vector<8x384xf32> to vector<8x256xf32>
    %156 = arith.addf %154, %155 : vector<8x256xf32>
    %157 = arith.negf %156 : vector<8x256xf32>
    %158 = math.exp %157 : vector<8x256xf32>
    %cst_46 = arith.constant 1.000000e+00 : f32
    %159 = vector.broadcast %cst_46 : f32 to vector<8x256xf32>
    %160 = arith.addf %159, %158 : vector<8x256xf32>
    %161 = arith.divf %159, %160 : vector<8x256xf32>
    %162 = vector.extract_strided_slice %161 {offsets = [0, 0], sizes = [8, 128], strides = [1, 1]} : vector<8x256xf32> to vector<8x128xf32>
    %163 = vector.extract_strided_slice %161 {offsets = [0, 128], sizes = [8, 128], strides = [1, 1]} : vector<8x256xf32> to vector<8x128xf32>
    %164 = vector.extract_strided_slice %153 {offsets = [0, 256], sizes = [8, 128], strides = [1, 1]} : vector<8x384xf32> to vector<8x128xf32>
    %165 = vector.extract_strided_slice %151 {offsets = [0, 256], sizes = [8, 128], strides = [1, 1]} : vector<8x384xf32> to vector<8x128xf32>
    %166 = arith.addf %165, %17 : vector<8x128xf32>
    %167 = arith.mulf %162, %166 : vector<8x128xf32>
    %168 = arith.addf %164, %167 : vector<8x128xf32>
    %169 = math.tanh %168 : vector<8x128xf32>
    %170 = arith.subf %146, %169 : vector<8x128xf32>
    %171 = arith.mulf %163, %170 : vector<8x128xf32>
    %172 = arith.addf %169, %171 : vector<8x128xf32>
    %173 = arith.index_cast %150 : i32 to index
    %c0_47 = arith.constant 0 : index
    %174 = vector.load %arg13[%173, %c0_47] : memref<64x128xf32, #tpu.memory_space<vmem>>, vector<8x128xf32>
    tpu.vector_store %arg13[%173, %c0_47], %172 {strides = array<i32>} : memref<64x128xf32, #tpu.memory_space<vmem>>, vector<8x128xf32>,
    %c6_i32 = arith.constant 6 : i32
    %c8_i32_48 = arith.constant 8 : i32
    %175 = arith.muli %c6_i32, %c8_i32_48 : i32
    %176 = tpu.assume_multiple %175, 8 : i32
    %cst_49 = arith.constant dense<0.000000e+00> : vector<8x384xf32>
    %177 = tpu.matmul %172, %14, %cst_49 {dimension_numbers = #tpu.dot_dimension_numbers<[1], [0], [0], [1], [0, 0, 1, 1], [], []>} : vector<8x128xf32>, vector<128x384xf32>, vector<8x384xf32> -> vector<8x384xf32>
    %178 = arith.index_cast %176 : i32 to index
    %c0_50 = arith.constant 0 : index
    %179 = vector.load %arg12[%178, %c0_50] : memref<64x384xf32, #tpu.memory_space<vmem>>, vector<8x384xf32>
    %180 = vector.extract_strided_slice %179 {offsets = [0, 0], sizes = [8, 256], strides = [1, 1]} : vector<8x384xf32> to vector<8x256xf32>
    %181 = vector.extract_strided_slice %177 {offsets = [0, 0], sizes = [8, 256], strides = [1, 1]} : vector<8x384xf32> to vector<8x256xf32>
    %182 = arith.addf %180, %181 : vector<8x256xf32>
    %183 = arith.negf %182 : vector<8x256xf32>
    %184 = math.exp %183 : vector<8x256xf32>
    %cst_51 = arith.constant 1.000000e+00 : f32
    %185 = vector.broadcast %cst_51 : f32 to vector<8x256xf32>
    %186 = arith.addf %185, %184 : vector<8x256xf32>
    %187 = arith.divf %185, %186 : vector<8x256xf32>
    %188 = vector.extract_strided_slice %187 {offsets = [0, 0], sizes = [8, 128], strides = [1, 1]} : vector<8x256xf32> to vector<8x128xf32>
    %189 = vector.extract_strided_slice %187 {offsets = [0, 128], sizes = [8, 128], strides = [1, 1]} : vector<8x256xf32> to vector<8x128xf32>
    %190 = vector.extract_strided_slice %179 {offsets = [0, 256], sizes = [8, 128], strides = [1, 1]} : vector<8x384xf32> to vector<8x128xf32>
    %191 = vector.extract_strided_slice %177 {offsets = [0, 256], sizes = [8, 128], strides = [1, 1]} : vector<8x384xf32> to vector<8x128xf32>
    %192 = arith.addf %191, %17 : vector<8x128xf32>
    %193 = arith.mulf %188, %192 : vector<8x128xf32>
    %194 = arith.addf %190, %193 : vector<8x128xf32>
    %195 = math.tanh %194 : vector<8x128xf32>
    %196 = arith.subf %172, %195 : vector<8x128xf32>
    %197 = arith.mulf %189, %196 : vector<8x128xf32>
    %198 = arith.addf %195, %197 : vector<8x128xf32>
    %199 = arith.index_cast %176 : i32 to index
    %c0_52 = arith.constant 0 : index
    %200 = vector.load %arg13[%199, %c0_52] : memref<64x128xf32, #tpu.memory_space<vmem>>, vector<8x128xf32>
    tpu.vector_store %arg13[%199, %c0_52], %198 {strides = array<i32>} : memref<64x128xf32, #tpu.memory_space<vmem>>, vector<8x128xf32>,
    %c7_i32 = arith.constant 7 : i32
    %c8_i32_53 = arith.constant 8 : i32
    %201 = arith.muli %c7_i32, %c8_i32_53 : i32
    %202 = tpu.assume_multiple %201, 8 : i32
    %cst_54 = arith.constant dense<0.000000e+00> : vector<8x384xf32>
    %203 = tpu.matmul %198, %14, %cst_54 {dimension_numbers = #tpu.dot_dimension_numbers<[1], [0], [0], [1], [0, 0, 1, 1], [], []>} : vector<8x128xf32>, vector<128x384xf32>, vector<8x384xf32> -> vector<8x384xf32>
    %204 = arith.index_cast %202 : i32 to index
    %c0_55 = arith.constant 0 : index
    %205 = vector.load %arg12[%204, %c0_55] : memref<64x384xf32, #tpu.memory_space<vmem>>, vector<8x384xf32>
    %206 = vector.extract_strided_slice %205 {offsets = [0, 0], sizes = [8, 256], strides = [1, 1]} : vector<8x384xf32> to vector<8x256xf32>
    %207 = vector.extract_strided_slice %203 {offsets = [0, 0], sizes = [8, 256], strides = [1, 1]} : vector<8x384xf32> to vector<8x256xf32>
    %208 = arith.addf %206, %207 : vector<8x256xf32>
    %209 = arith.negf %208 : vector<8x256xf32>
    %210 = math.exp %209 : vector<8x256xf32>
    %cst_56 = arith.constant 1.000000e+00 : f32
    %211 = vector.broadcast %cst_56 : f32 to vector<8x256xf32>
    %212 = arith.addf %211, %210 : vector<8x256xf32>
    %213 = arith.divf %211, %212 : vector<8x256xf32>
    %214 = vector.extract_strided_slice %213 {offsets = [0, 0], sizes = [8, 128], strides = [1, 1]} : vector<8x256xf32> to vector<8x128xf32>
    %215 = vector.extract_strided_slice %213 {offsets = [0, 128], sizes = [8, 128], strides = [1, 1]} : vector<8x256xf32> to vector<8x128xf32>
    %216 = vector.extract_strided_slice %205 {offsets = [0, 256], sizes = [8, 128], strides = [1, 1]} : vector<8x384xf32> to vector<8x128xf32>
    %217 = vector.extract_strided_slice %203 {offsets = [0, 256], sizes = [8, 128], strides = [1, 1]} : vector<8x384xf32> to vector<8x128xf32>
    %218 = arith.addf %217, %17 : vector<8x128xf32>
    %219 = arith.mulf %214, %218 : vector<8x128xf32>
    %220 = arith.addf %216, %219 : vector<8x128xf32>
    %221 = math.tanh %220 : vector<8x128xf32>
    %222 = arith.subf %198, %221 : vector<8x128xf32>
    %223 = arith.mulf %215, %222 : vector<8x128xf32>
    %224 = arith.addf %221, %223 : vector<8x128xf32>
    %225 = arith.index_cast %202 : i32 to index
    %c0_57 = arith.constant 0 : index
    %226 = vector.load %arg13[%225, %c0_57] : memref<64x128xf32, #tpu.memory_space<vmem>>, vector<8x128xf32>
    tpu.vector_store %arg13[%225, %c0_57], %224 {strides = array<i32>} : memref<64x128xf32, #tpu.memory_space<vmem>>, vector<8x128xf32>,
    %c8_i32_58 = arith.constant 8 : i32
    %c0_59 = arith.constant 0 : index
    %c0_60 = arith.constant 0 : index
    %227 = vector.load %arg11[%c0_59, %c0_60] : memref<8x128xf32, #tpu.memory_space<vmem>>, vector<8x128xf32>
    tpu.vector_store %arg11[%c0_59, %c0_60], %224 {strides = array<i32>} : memref<8x128xf32, #tpu.memory_space<vmem>>, vector<8x128xf32>,
    %c0_61 = arith.constant 0 : index
    %c0_62 = arith.constant 0 : index
    %228 = vector.load %arg13[%c0_61, %c0_62] : memref<64x128xf32, #tpu.memory_space<vmem>>, vector<64x128xf32>
    %c0_63 = arith.constant 0 : index
    %c0_64 = arith.constant 0 : index
    %229 = vector.load %arg7[%c0_63, %c0_64] : memref<128x128xf32, #tpu.memory_space<vmem>>, vector<128x128xf32>
    %cst_65 = arith.constant dense<0.000000e+00> : vector<64x128xf32>
    %230 = tpu.matmul %228, %229, %cst_65 {dimension_numbers = #tpu.dot_dimension_numbers<[1], [0], [0], [1], [0, 0, 1, 1], [], []>} : vector<64x128xf32>, vector<128x128xf32>, vector<64x128xf32> -> vector<64x128xf32>
    %c0_66 = arith.constant 0 : index
    %c0_67 = arith.constant 0 : index
    %231 = vector.load %arg8[%c0_66, %c0_67] : memref<1x128xf32, #tpu.memory_space<vmem>>, vector<1x128xf32>
    %232 = vector.broadcast %231 : vector<1x128xf32> to vector<64x128xf32>
    %233 = arith.addf %230, %232 : vector<64x128xf32>
    %c0_68 = arith.constant 0 : index
    %c0_69 = arith.constant 0 : index
    %234 = vector.load %arg10[%c0_68, %c0_69] : memref<64x128xf32, #tpu.memory_space<vmem>>, vector<64x128xf32>
    tpu.vector_store %arg10[%c0_68, %c0_69], %233 {strides = array<i32>} : memref<64x128xf32, #tpu.memory_space<vmem>>, vector<64x128xf32>,
    return
  }
}

</mosaic_0001>

<bundles_post_ra>
// kernel: rnn_forward.1
= control target key start
LH: loop header
LB: loop body
LE: loop exit
PB: predicated region body
PF: predicated region fallthrough
CT: control target
= control target key end

     0   :  { %vm53_vm0 = vcmask 261120   ;;  %s2904_s1 = inlined_call_operand.vmem [shape: f32[32,128], index: 1, kind: input, shape index: {}]   ;;  %s2905_s3 = inlined_call_operand.vmem [shape: f32[128,384], index: 3, kind: input, shape index: {}]   ;;  %s2906_s0 = inlined_call_operand.vmem [shape: f32[64,32], index: 0, kind: input, shape index: {}]   ;;  %s2907_s5 = inlined_call_operand.vmem [shape: f32[128,384], index: 5, kind: input, shape index: {}]   ;;  %s2908_s2 = inlined_call_operand.vmem [shape: f32[1,128], index: 2, kind: input, shape index: {}]   ;;  %s2909_s9 = inlined_call_operand.vmem [shape: f32[8,128], index: 9, kind: input, shape index: {}]   ;;  %s2910_s6 = inlined_call_operand.vmem [shape: f32[1,128], index: 6, kind: input, shape index: {}]   ;;  %s2911_s4 = inlined_call_operand.vmem [shape: f32[1,384], index: 4, kind: input, shape index: {}]   ;;  %s2912_s7 = inlined_call_operand.vmem [shape: f32[128,128], index: 7, kind: input, shape index: {}]   ;;  %s2913_s8 = inlined_call_operand.vmem [shape: f32[1,128], index: 8, kind: input, shape index: {}]   ;;  %s2914_s10 = inlined_call_operand.vmem [shape: f32[64,128], index: 10, kind: output, shape index: {0}]   ;;  %s2915_s11 = inlined_call_operand.vmem [shape: f32[8,128], index: 11, kind: output, shape index: {1}]  }
   0x1   :  { %v48_v0 = vld [vmem:[%s2904_s1 + $0x18] sm:$0xff]  ;;  %v47_v1 = vld [vmem:[%s2904_s1 + $0x10] sm:$0xff]  ;;  %v46_v2 = vld [vmem:[%s2904_s1 + $0x8] sm:$0xff] }
   0x2   :  { %90 = vmatpush.msra.mxu1 %v48_v0  ;;  %1419 = vmatpush.msra.mxu2 %v48_v0  ;;  %v45_v3 = vld [vmem:[%s2904_s1] sm:$0xff]  ;;  %v174_v4 = vld [vmem:[%s2905_s3 + $0x178] sm:$0xff]  ;;  %v172_v7 = vld [vmem:[%s2905_s3 + $0x168] sm:$0xff] }
   0x3   :  { %v37_v5 = vld [vmem:[%s2906_s0] sm:$0xff]  ;;  %v173_v8 = vld [vmem:[%s2905_s3 + $0x170] sm:$0xff]  ;;  %265 = vmatpush.msra.mxu3 %v174_v4  ;;  %v1648_v10 = vld [vmem:[%s2907_s5 + $0x168] sm:$0xff] }
   0x4   :  { %91 = vmatpush.msra.mxu1 %v47_v1  ;;  %1420 = vmatpush.msra.mxu2 %v47_v1  ;;  %v41_v6 = vld [vmem:[%s2906_s0 + $0x20] sm:$0xff]  ;;  %v169_v11 = vld [vmem:[%s2905_s3 + $0x150] sm:$0xff]  ;;  %v170_v12 = vld [vmem:[%s2905_s3 + $0x158] sm:$0xff] }
   0x5   :  { %v171_v9 = vld [vmem:[%s2905_s3 + $0x160] sm:$0xff]  ;;  %v168_v13 = vld [vmem:[%s2905_s3 + $0x148] sm:$0xff]  ;;  %v1664_v14 = vld [vmem:[%s2907_s5 + $0x150] sm:$0xff]  ;;  %383 = vmatpush.msra.mxu0 %v1648_v10 }
   0x6   :  { %92 = vmatpush.msra.mxu1 %v46_v2  ;;  %1421 = vmatpush.msra.mxu2 %v46_v2  ;;  %v166_v15 = vld [vmem:[%s2905_s3 + $0x138] sm:$0xff]  ;;  %v167_v16 = vld [vmem:[%s2905_s3 + $0x140] sm:$0xff]  ;;  %v165_v17 = vld [vmem:[%s2905_s3 + $0x130] sm:$0xff] }
   0x7   :  { %266 = vmatpush.msra.mxu3 %v171_v9  ;;  %v1679_v18 = vld [vmem:[%s2907_s5 + $0x138] sm:$0xff]  ;;  %384 = vmatpush.msra.mxu0 %v1664_v14  ;;  %v163_v19 = vld [vmem:[%s2905_s3 + $0x120] sm:$0xff]  ;;  %v164_v20 = vld [vmem:[%s2905_s3 + $0x128] sm:$0xff] }
   0x8   :  { %93 = vmatpush.msra.mxu1 %v45_v3  ;;  %1422 = vmatpush.msra.mxu2 %v45_v3  ;;  %v38_v21 = vld [vmem:[%s2906_s0 + $0x8] sm:$0xff]  ;;  %v161_v24 = vld [vmem:[%s2905_s3 + $0x110] sm:$0xff]  ;;  %v162_v25 = vld [vmem:[%s2905_s3 + $0x118] sm:$0xff] }
   0x9   :  { %1395 = vmatmul.msk.f32.vlgmr.msra.gmra.mxu1 %vm53_vm0, %v37_v5  ;;  %1399 = vmatmul.msk.f32.vlgmr.msra.gmra.mxu2 %vm53_vm0, %v41_v6  ;;  %v42_v22 = vld [vmem:[%s2906_s0 + $0x28] sm:$0xff]  ;;  %v1707_v26 = vld [vmem:[%s2907_s5 + $0x120] sm:$0xff]  ;;  %v157_v27 = vld [vmem:[%s2905_s3 + $0xf0] sm:$0xff] }
   0xa   :  { %183 = vmatpush.msrb.mxu1 %v172_v7  ;;  %224 = vmatpush.msrb.mxu2 %v173_v8  ;;  %v160_v23 = vld [vmem:[%s2905_s3 + $0x108] sm:$0xff]  ;;  %v158_v28 = vld [vmem:[%s2905_s3 + $0xf8] sm:$0xff]  ;;  %v159_v29 = vld [vmem:[%s2905_s3 + $0x100] sm:$0xff] }
   0xb   :  { %267 = vmatpush.msra.mxu3 %v168_v13  ;;  %385 = vmatpush.msra.mxu0 %v1679_v18  ;;  %v1723_v30 = vld [vmem:[%s2907_s5 + $0x108] sm:$0xff]  ;;  %v154_v31 = vld [vmem:[%s2905_s3 + $0xd8] sm:$0xff]  ;;  %v155_v32 = vld [vmem:[%s2905_s3 + $0xe0] sm:$0xff] }
   0xc   :  { %184 = vmatpush.msrb.mxu1 %v169_v11  ;;  %225 = vmatpush.msrb.mxu2 %v170_v12  ;;  %v156_v33 = vld [vmem:[%s2905_s3 + $0xe8] sm:$0xff]  ;;  %v1738_v34 = vld [vmem:[%s2907_s5 + $0xf0] sm:$0xff]  ;;  %v151_v35 = vld [vmem:[%s2905_s3 + $0xc0] sm:$0xff] }
   0xd   :  { %268 = vmatpush.msra.mxu3 %v165_v17  ;;  %386 = vmatpush.msra.mxu0 %v1707_v26  ;;  %v152_v36 = vld [vmem:[%s2905_s3 + $0xc8] sm:$0xff]  ;;  %v39_v37 = vld [vmem:[%s2906_s0 + $0x10] sm:$0xff]  ;;  %v1760_v40 = vld [vmem:[%s2907_s5 + $0xd8] sm:$0xff] }
   0xe   :  { %185 = vmatpush.msrb.mxu1 %v166_v15  ;;  %226 = vmatpush.msrb.mxu2 %v167_v16  ;;  %v43_v38 = vld [vmem:[%s2906_s0 + $0x30] sm:$0xff]  ;;  %v148_v41 = vld [vmem:[%s2905_s3 + $0xa8] sm:$0xff]  ;;  %v150_v43 = vld [vmem:[%s2905_s3 + $0xb8] sm:$0xff] }
   0xf   :  { %269 = vmatpush.msra.mxu3 %v162_v25  ;;  %387 = vmatpush.msra.mxu0 %v1723_v30  ;;  %v153_v39 = vld [vmem:[%s2905_s3 + $0xd0] sm:$0xff]  ;;  %v1776_v44 = vld [vmem:[%s2907_s5 + $0xc0] sm:$0xff]  ;;  %v146_v46 = vld [vmem:[%s2905_s3 + $0x98] sm:$0xff] }
  0x10   :  { %186 = vmatpush.msrb.mxu1 %v163_v19  ;;  %227 = vmatpush.msrb.mxu2 %v164_v20  ;;  %v149_v42 = vld [vmem:[%s2905_s3 + $0xb0] sm:$0xff]  ;;  %v147_v47 = vld [vmem:[%s2905_s3 + $0xa0] sm:$0xff]  ;;  %v1791_v48 = vld [vmem:[%s2907_s5 + $0xa8] sm:$0xff] }
  0x11   :  { %1396 = vmatmul.msk.f32.gmra.mxu1 %vm53_vm0, %v38_v21  ;;  %1400 = vmatmul.msk.f32.gmra.mxu2 %vm53_vm0, %v42_v22  ;;  %v145_v45 = vld [vmem:[%s2905_s3 + $0x90] sm:$0xff]  ;;  %v142_v49 = vld [vmem:[%s2905_s3 + $0x78] sm:$0xff]  ;;  %v143_v50 = vld [vmem:[%s2905_s3 + $0x80] sm:$0xff] }
  0x12   :  { %187 = vmatpush.msrb.mxu1 %v160_v23  ;;  %228 = vmatpush.msrb.mxu2 %v161_v24  ;;  %v144_v51 = vld [vmem:[%s2905_s3 + $0x88] sm:$0xff]  ;;  %v1806_v52 = vld [vmem:[%s2907_s5 + $0x90] sm:$0xff]  ;;  %v40_v53 = vld [vmem:[%s2906_s0 + $0x18] sm:$0xff] }
  0x13   :  { %270 = vmatpush.msra.mxu3 %v159_v29  ;;  %388 = vmatpush.msra.mxu0 %v1738_v34  ;;  %v44_v54 = vld [vmem:[%s2906_s0 + $0x38] sm:$0xff]  ;;  %v139_v55 = vld [vmem:[%s2905_s3 + $0x60] sm:$0xff]  ;;  %v140_v56 = vld [vmem:[%s2905_s3 + $0x68] sm:$0xff] }
  0x14   :  { %188 = vmatpush.msrb.mxu1 %v157_v27  ;;  %229 = vmatpush.msrb.mxu2 %v158_v28  ;;  %v141_v57 = vld [vmem:[%s2905_s3 + $0x70] sm:$0xff]  ;;  %v1828_v58 = vld [vmem:[%s2907_s5 + $0x78] sm:$0xff]  ;;  %v136_v59 = vld [vmem:[%s2905_s3 + $0x48] sm:$0xff] }
  0x15   :  { %271 = vmatpush.msra.mxu3 %v156_v33  ;;  %389 = vmatpush.msra.mxu0 %v1760_v40  ;;  %v137_v60 = vld [vmem:[%s2905_s3 + $0x50] sm:$0xff]  ;;  %v138_v61 = vld [vmem:[%s2905_s3 + $0x58] sm:$0xff]  ;;  %v1844_v62 = vld [vmem:[%s2907_s5 + $0x60] sm:$0xff] }
  0x16   :  { %189 = vmatpush.msrb.mxu1 %v154_v31  ;;  %230 = vmatpush.msrb.mxu2 %v155_v32  ;;  %v133_v63 = vld [vmem:[%s2905_s3 + $0x30] sm:$0xff]  ;;  %v134_v0 = vld [vmem:[%s2905_s3 + $0x38] sm:$0xff]  ;;  %v135_v1 = vld [vmem:[%s2905_s3 + $0x40] sm:$0xff] }
  0x17   :  { %272 = vmatpush.msra.mxu3 %v153_v39  ;;  %390 = vmatpush.msra.mxu0 %v1776_v44  ;;  %v1860_v2 = vld [vmem:[%s2907_s5 + $0x48] sm:$0xff]  ;;  %v130_v3 = vld [vmem:[%s2905_s3 + $0x18] sm:$0xff]  ;;  %v131_v4 = vld [vmem:[%s2905_s3 + $0x20] sm:$0xff] }
  0x18   :  { %190 = vmatpush.msrb.mxu1 %v151_v35  ;;  %231 = vmatpush.msrb.mxu2 %v152_v36  ;;  %v132_v5 = vld [vmem:[%s2905_s3 + $0x28] sm:$0xff]  ;;  %v1875_v6 = vld [vmem:[%s2907_s5 + $0x30] sm:$0xff]  ;;  %v127_v7 = vld [vmem:[%s2905_s3] sm:$0xff] }
  0x19   :  { %1397 = vmatmul.msk.f32.gmra.mxu1 %vm53_vm0, %v39_v37  ;;  %1401 = vmatmul.msk.f32.gmra.mxu2 %vm53_vm0, %v43_v38  ;;  %v128_v8 = vld [vmem:[%s2905_s3 + $0x8] sm:$0xff]  ;;  %v129_v9 = vld [vmem:[%s2905_s3 + $0x10] sm:$0xff]  ;;  %v1890_v11 = vld [vmem:[%s2907_s5 + $0x18] sm:$0xff] }
  0x1a   :  { %191 = vmatpush.msrb.mxu1 %v148_v41  ;;  %232 = vmatpush.msrb.mxu2 %v149_v42  ;;  %2930 = vst [vmem:[#allocation4_spill] sm:$0xff] %v1890_v11  ;;  %v1896_v12 = vld [vmem:[%s2907_s5 + $0x170] sm:$0xff]  ;;  %v1901_v13 = vld [vmem:[%s2907_s5] sm:$0xff]  ;;  %v1918_v16 = vld [vmem:[%s2907_s5 + $0x158] sm:$0xff] }
  0x1b   :  { %273 = vmatpush.msra.mxu3 %v150_v43  ;;  %391 = vmatpush.msra.mxu0 %v1791_v48  ;;  %2931 = vst [vmem:[#allocation5_spill] sm:$0xff] %v1901_v13  ;;  %v1906_v15 = vld [vmem:[%s2909_s9] sm:$0xff]  ;;  %v1931_v19 = vld [vmem:[%s2907_s5 + $0x178] sm:$0xff]  ;;  %v1942_v20 = vld [vmem:[%s2907_s5 + $0x128] sm:$0xff] }
  0x1c   :  { %192 = vmatpush.msrb.mxu1 %v145_v45  ;;  %233 = vmatpush.msrb.mxu2 %v146_v46  ;;  %v1926_v17 = vld [vmem:[%s2907_s5 + $0x140] sm:$0xff]  ;;  %v1956_v22 = vld [vmem:[%s2907_s5 + $0x110] sm:$0xff]  ;;  %v1961_v23 = vld [vmem:[%s2907_s5 + $0x148] sm:$0xff] }
  0x1d   :  { %274 = vmatpush.msra.mxu3 %v147_v47  ;;  %392 = vmatpush.msra.mxu0 %v1806_v52  ;;  %v1947_v21 = vld [vmem:[%s2907_s5 + $0x160] sm:$0xff]  ;;  %v1971_v24 = vld [vmem:[%s2907_s5 + $0xf8] sm:$0xff]  ;;  %v1976_v25 = vld [vmem:[%s2907_s5 + $0x130] sm:$0xff] }
  0x1e   :  { %193 = vmatpush.msrb.mxu1 %v142_v49  ;;  %234 = vmatpush.msrb.mxu2 %v143_v50  ;;  %v1983_v27 = vld [vmem:[%s2908_s2] ss:$0 sm:$0xff]  ;;  %v1995_v29 = vld [vmem:[%s2907_s5 + $0x118] sm:$0xff]  ;;  %v2000_v31 = vld [vmem:[%s2907_s5 + $0xc8] sm:$0xff] }
  0x1f   :  { %275 = vmatpush.msra.mxu3 %v144_v51  ;;  %393 = vmatpush.msra.mxu0 %v1828_v58  ;;  %v1990_v28 = vld [vmem:[%s2907_s5 + $0xe0] sm:$0xff]  ;;  %v2020_v37 = vld [vmem:[%s2907_s5 + $0xb0] sm:$0xff]  ;;  %v2025_v38 = vld [vmem:[%s2907_s5 + $0xe8] sm:$0xff] }
  0x20   :  { %194 = vmatpush.msrb.mxu1 %v139_v55  ;;  %235 = vmatpush.msrb.mxu2 %v140_v56  ;;  %v2007_v32 = vld [vmem:[%s2907_s5 + $0x100] sm:$0xff]  ;;  %v2030_v39 = vld [vmem:[%s2907_s5 + $0x98] sm:$0xff]  ;;  %v2037_v41 = vld [vmem:[%s2907_s5 + $0xd0] sm:$0xff] }
  0x21   :  { %1398 = vmatmul.msk.f32.gmra.mxu1 %vm53_vm0, %v40_v53  ;;  %1402 = vmatmul.msk.f32.gmra.mxu2 %vm53_vm0, %v44_v54  ;;  %v2050_v46 = vld [vmem:[%s2907_s5 + $0x80] sm:$0xff]  ;;  %v2055_v47 = vld [vmem:[%s2907_s5 + $0xb8] sm:$0xff]  ;;  %v2060_v49 = vld [vmem:[%s2907_s5 + $0x68] sm:$0xff] }
  0x22   :  { %276 = vmatpush.msra.mxu3 %v141_v57  ;;  %195 = vmatpush.msrb.mxu1 %v136_v59  ;;  %v2067_v50 = vld [vmem:[%s2907_s5 + $0xa0] sm:$0xff]  ;;  %v2080_v56 = vld [vmem:[%s2907_s5 + $0x50] sm:$0xff]  ;;  %v2085_v57 = vld [vmem:[%s2907_s5 + $0x88] sm:$0xff] }
  0x23   :  { %236 = vmatpush.msrb.mxu2 %v137_v60  ;;  %394 = vmatpush.msra.mxu0 %v1844_v62  ;;  %v2090_v59 = vld [vmem:[%s2907_s5 + $0x38] sm:$0xff]  ;;  %v2097_v60 = vld [vmem:[%s2907_s5 + $0x70] sm:$0xff] }
  0x24   :  { %277 = vmatpush.msra.mxu3 %v138_v61  ;;  %196 = vmatpush.msrb.mxu1 %v133_v63  ;;  %2932 = vst [vmem:[#allocation6_spill] sm:$0xff] %v2090_v59 }
  0x25   :  { %237 = vmatpush.msrb.mxu2 %v134_v0  ;;  %395 = vmatpush.msra.mxu0 %v1860_v2 }
  0x26   :  { %278 = vmatpush.msra.mxu3 %v135_v1  ;;  %197 = vmatpush.msrb.mxu1 %v130_v3 }
  0x27   :  { %238 = vmatpush.msrb.mxu2 %v131_v4  ;;  %396 = vmatpush.msra.mxu0 %v1875_v6  ;;  %v2111_v4 = vld [vmem:[%s2907_s5 + $0x20] sm:$0xff] }
  0x28   :  { %279 = vmatpush.msra.mxu3 %v132_v5  ;;  %198 = vmatpush.msrb.mxu1 %v127_v7  ;;  %2933 = vst [vmem:[#allocation7_spill] sm:$0xff] %v2111_v4  ;;  %v2116_v5 = vld [vmem:[%s2907_s5 + $0x58] sm:$0xff]  ;;  %v2121_v7 = vld [vmem:[%s2907_s5 + $0x40] sm:$0xff] }
  0x29   :  { %239 = vmatpush.msrb.mxu2 %v128_v8  ;;  %397 = vmatpush.msra.mxu0 %v1890_v11  ;;  %v2128_v8 = vld [vmem:[%s2907_s5 + $0x8] sm:$0xff] }
  0x2a   :  { %280 = vmatpush.msra.mxu3 %v129_v9  ;;  %403 = vmatpush.msra.mxu1 %v1896_v12  ;;  %2934 = vst [vmem:[#allocation8_spill] sm:$0xff] %v2128_v8  ;;  %v2133_v9 = vld [vmem:[%s2907_s5 + $0x28] sm:$0xff] }
  0x2b   :  { %398 = vmatpush.msra.mxu0 %v1901_v13  ;;  %423 = vmatpush.msra.mxu2 %v1931_v19  ;;  %2935 = vst [vmem:[#allocation9_spill] sm:$0xff] %v2133_v9 }
  0x2c   :  { %497 = vmatpush.msrb.mxu3 %v1648_v10  ;;  %399 = vmatmul.f32.vlgmr.msra.gmra.mxu0 %v1906_v15 }
  0x2d   :  { %517 = vmatpush.msrb.mxu0 %v1896_v12  ;;  %404 = vmatpush.msra.mxu1 %v1918_v16 }
  0x2e   :  { %498 = vmatpush.msrb.mxu3 %v1664_v14  ;;  %424 = vmatpush.msra.mxu2 %v1947_v21 }
  0x2f   :  { %518 = vmatpush.msrb.mxu0 %v1918_v16  ;;  %405 = vmatpush.msra.mxu1 %v1926_v17 }
  0x30   :  { %499 = vmatpush.msrb.mxu3 %v1679_v18  ;;  %425 = vmatpush.msra.mxu2 %v1961_v23 }
  0x31   :  { %519 = vmatpush.msrb.mxu0 %v1926_v17  ;;  %406 = vmatpush.msra.mxu1 %v1942_v20 }
  0x32   :  { %500 = vmatpush.msrb.mxu3 %v1707_v26  ;;  %426 = vmatpush.msra.mxu2 %v1976_v25 }
  0x33   :  { %520 = vmatpush.msrb.mxu0 %v1942_v20  ;;  %407 = vmatpush.msra.mxu1 %v1956_v22 }
  0x34   :  { %501 = vmatpush.msrb.mxu3 %v1723_v30  ;;  %427 = vmatpush.msra.mxu2 %v1995_v29 }
  0x35   :  { %521 = vmatpush.msrb.mxu0 %v1956_v22  ;;  %408 = vmatpush.msra.mxu1 %v1971_v24 }
  0x36   :  { %502 = vmatpush.msrb.mxu3 %v1738_v34  ;;  %428 = vmatpush.msra.mxu2 %v2007_v32 }
  0x37   :  { %522 = vmatpush.msrb.mxu0 %v1971_v24  ;;  %409 = vmatpush.msra.mxu1 %v1990_v28 }
  0x38   :  { %503 = vmatpush.msrb.mxu3 %v1760_v40  ;;  %429 = vmatpush.msra.mxu2 %v2025_v38 }
  0x39   :  { %523 = vmatpush.msrb.mxu0 %v1990_v28  ;;  %410 = vmatpush.msra.mxu1 %v2000_v31 }
  0x3a   :  { %504 = vmatpush.msrb.mxu3 %v1776_v44  ;;  %430 = vmatpush.msra.mxu2 %v2037_v41 }
  0x3b   :  { %524 = vmatpush.msrb.mxu0 %v2000_v31  ;;  %411 = vmatpush.msra.mxu1 %v2020_v37 }
  0x3c   :  { %505 = vmatpush.msrb.mxu3 %v1791_v48  ;;  %431 = vmatpush.msra.mxu2 %v2055_v47 }
  0x3d   :  { %525 = vmatpush.msrb.mxu0 %v2020_v37  ;;  %412 = vmatpush.msra.mxu1 %v2030_v39 }
  0x3e   :  { %506 = vmatpush.msrb.mxu3 %v1806_v52  ;;  %432 = vmatpush.msra.mxu2 %v2067_v50 }
  0x3f   :  { %526 = vmatpush.msrb.mxu0 %v2030_v39  ;;  %413 = vmatpush.msra.mxu1 %v2050_v46 }
  0x40   :  { %507 = vmatpush.msrb.mxu3 %v1828_v58  ;;  %433 = vmatpush.msra.mxu2 %v2085_v57 }
  0x41   :  { %527 = vmatpush.msrb.mxu0 %v2050_v46  ;;  %414 = vmatpush.msra.mxu1 %v2060_v49 }
  0x42   :  { %508 = vmatpush.msrb.mxu3 %v1844_v62  ;;  %434 = vmatpush.msra.mxu2 %v2097_v60 }
  0x43   :  { %528 = vmatpush.msrb.mxu0 %v2060_v49  ;;  %415 = vmatpush.msra.mxu1 %v2080_v56 }
  0x44   :  { %509 = vmatpush.msrb.mxu3 %v1860_v2  ;;  %435 = vmatpush.msra.mxu2 %v2116_v5 }
  0x45   :  { %529 = vmatpush.msrb.mxu0 %v2080_v56  ;;  %416 = vmatpush.msra.mxu1 %v2090_v59 }
  0x46   :  { %510 = vmatpush.msrb.mxu3 %v1875_v6  ;;  %436 = vmatpush.msra.mxu2 %v2121_v7 }
  0x47   :  { %530 = vmatpush.msrb.mxu0 %v2090_v59  ;;  %417 = vmatpush.msra.mxu1 %v2111_v4 }
  0x48   :  { %511 = vmatpush.msrb.mxu3 %v1890_v11  ;;  %437 = vmatpush.msra.mxu2 %v2133_v9 }
  0x49   :  { %531 = vmatpush.msrb.mxu0 %v2111_v4  ;;  %418 = vmatpush.msra.mxu1 %v2128_v8 }
  0x4a   :  { %512 = vmatpush.msrb.mxu3 %v1901_v13 }
  0x4b   :  { %532 = vmatpush.msrb.mxu0 %v2128_v8 }
  0x4d   :  { %652 = vmatpush.msra.mxu0 %v1931_v19 }
  0x4f   :  { %653 = vmatpush.msra.mxu0 %v1947_v21 }
  0x51   :  { %654 = vmatpush.msra.mxu0 %v1961_v23 }
  0x53   :  { %655 = vmatpush.msra.mxu0 %v1976_v25 }
  0x55   :  { %656 = vmatpush.msra.mxu0 %v1995_v29 }
  0x57   :  { %657 = vmatpush.msra.mxu0 %v2007_v32 }
  0x59   :  { %658 = vmatpush.msra.mxu0 %v2025_v38 }
  0x5b   :  { %659 = vmatpush.msra.mxu0 %v2037_v41 }
  0x5d   :  { %660 = vmatpush.msra.mxu0 %v2055_v47 }
  0x5f   :  { %661 = vmatpush.msra.mxu0 %v2067_v50 }
  0x61   :  { %662 = vmatpush.msra.mxu0 %v2085_v57 }
  0x63   :  { %663 = vmatpush.msra.mxu0 %v2097_v60 }
  0x65   :  { %664 = vmatpush.msra.mxu0 %v2116_v5 }
  0x67   :  { %665 = vmatpush.msra.mxu0 %v2121_v7 }
  0x69   :  { %666 = vmatpush.msra.mxu0 %v2133_v9 }
  0x86   :  { %v95_v33 = vpop.f32.mrf.mxu1 }
  0x87   :  { %v96_v35 = vadd.f32 %v1983_v27, %v95_v33 }
  0x89   :  { %v119_v36 = vmax.f32 %v96_v35, 0.0  ;;  %v2145_v35 = vld [vmem:[%s2907_s5 + $0x10] sm:$0xff] }
  0x8a   :  { %2936 = vst [vmem:[#allocation10_spill] sm:$0xff] %v2145_v35  ;;  %438 = vmatpush.msra.mxu2 %v2145_v35  ;;  %667 = vmatpush.msra.mxu0 %v2145_v35 }
  0x8b   :  { %199 = vmatmul.f32.vlgmr.msrb.gmra.mxu1 %v119_v36  ;;  %240 = vmatmul.f32.vlgmr.msrb.gmra.mxu2 %v119_v36 }
  0x8c   :  { %281 = vmatmul.f32.vlgmr.msra.gmra.mxu3 %v119_v36  ;;  %v107_v55 = vpop.f32.mrf.mxu2  ;;  %537 = vmatpush.msrb.mxu1 %v1931_v19 }
  0x8d   :  { %632 = vmatpush.msra.mxu3 %v1896_v12  ;;  %v108_v1 = vadd.f32 %v1983_v27, %v107_v55  ;;  %612 = vmatpush.msrb.mxu2 %v1648_v10 }
  0x8e   :  { %v98_v42 = vpop.f32.mrf.mxu1  ;;  %538 = vmatpush.msrb.mxu1 %v1947_v21 }
  0x8f   :  { %v99_v43 = vadd.f32 %v1983_v27, %v98_v42  ;;  %633 = vmatpush.msra.mxu3 %v1918_v16  ;;  %v123_v33 = vmax.f32 %v108_v1, 0.0  ;;  %613 = vmatpush.msrb.mxu2 %v1664_v14 }
  0x90   :  { %539 = vmatpush.msrb.mxu1 %v1961_v23 }
  0x91   :  { %v120_v45 = vmax.f32 %v99_v43, 0.0  ;;  %634 = vmatpush.msra.mxu3 %v1926_v17  ;;  %614 = vmatpush.msrb.mxu2 %v1679_v18 }
  0x92   :  { %540 = vmatpush.msrb.mxu1 %v1976_v25 }
  0x93   :  { %202 = vmatmul.f32.gmra.mxu1 %v120_v45  ;;  %243 = vmatmul.f32.gmra.mxu2 %v120_v45 }
  0x94   :  { %284 = vmatmul.f32.gmra.mxu3 %v120_v45  ;;  %v110_v3 = vpop.f32.mrf.mxu2  ;;  %541 = vmatpush.msrb.mxu1 %v1995_v29 }
  0x95   :  { %635 = vmatpush.msra.mxu3 %v1942_v20  ;;  %v111_v36 = vadd.f32 %v1983_v27, %v110_v3  ;;  %615 = vmatpush.msrb.mxu2 %v1707_v26 }
  0x96   :  { %v101_v51 = vpop.f32.mrf.mxu1  ;;  %542 = vmatpush.msrb.mxu1 %v2007_v32 }
  0x97   :  { %v102_v53 = vadd.f32 %v1983_v27, %v101_v51  ;;  %636 = vmatpush.msra.mxu3 %v1956_v22  ;;  %v124_v43 = vmax.f32 %v111_v36, 0.0  ;;  %616 = vmatpush.msrb.mxu2 %v1723_v30 }
  0x98   :  { %543 = vmatpush.msrb.mxu1 %v2025_v38 }
  0x99   :  { %v121_v54 = vmax.f32 %v102_v53, 0.0  ;;  %637 = vmatpush.msra.mxu3 %v1971_v24  ;;  %617 = vmatpush.msrb.mxu2 %v1738_v34 }
  0x9a   :  { %544 = vmatpush.msrb.mxu1 %v2037_v41 }
  0x9b   :  { %205 = vmatmul.f32.gmra.mxu1 %v121_v54  ;;  %246 = vmatmul.f32.gmra.mxu2 %v121_v54 }
  0x9c   :  { %287 = vmatmul.f32.gmra.mxu3 %v121_v54  ;;  %v113_v42 = vpop.f32.mrf.mxu2  ;;  %545 = vmatpush.msrb.mxu1 %v2055_v47 }
  0x9d   :  { %638 = vmatpush.msra.mxu3 %v1990_v28  ;;  %v114_v45 = vadd.f32 %v1983_v27, %v113_v42  ;;  %618 = vmatpush.msrb.mxu2 %v1760_v40 }
  0x9e   :  { %v104_v61 = vpop.f32.mrf.mxu1  ;;  %546 = vmatpush.msrb.mxu1 %v2067_v50 }
  0x9f   :  { %v105_v63 = vadd.f32 %v1983_v27, %v104_v61  ;;  %639 = vmatpush.msra.mxu3 %v2000_v31  ;;  %v125_v51 = vmax.f32 %v114_v45, 0.0  ;;  %619 = vmatpush.msrb.mxu2 %v1776_v44  ;;  %v175_v61 = vld [vmem:[%s2911_s4] sm:$0x7] }
  0xa0   :  { %547 = vmatpush.msrb.mxu1 %v2085_v57  ;;  %v178_v36 = vperm.slane %v175_v61, 1  ;;  %v2247_v42 = vperm.slane %v175_v61, 2 }
  0xa1   :  { %v122_v0 = vmax.f32 %v105_v63, 0.0  ;;  %640 = vmatpush.msra.mxu3 %v2020_v37  ;;  %620 = vmatpush.msrb.mxu2 %v1791_v48 }
  0xa2   :  { %548 = vmatpush.msrb.mxu1 %v2097_v60 }
  0xa3   :  { %208 = vmatmul.f32.gmra.mxu1 %v122_v0  ;;  %249 = vmatmul.f32.gmra.mxu2 %v122_v0 }
  0xa4   :  { %290 = vmatmul.f32.gmra.mxu3 %v122_v0  ;;  %v116_v53 = vpop.f32.mrf.mxu2  ;;  %549 = vmatpush.msrb.mxu1 %v2116_v5  ;;  %v177_v0 = vperm.slane %v175_v61, 0 }
  0xa5   :  { %641 = vmatpush.msra.mxu3 %v2030_v39  ;;  %v117_v54 = vadd.f32 %v1983_v27, %v116_v53  ;;  %621 = vmatpush.msrb.mxu2 %v1806_v52 }
  0xa6   :  { %550 = vmatpush.msrb.mxu1 %v2121_v7 }
  0xa7   :  { %642 = vmatpush.msra.mxu3 %v2050_v46  ;;  %v126_v55 = vmax.f32 %v117_v54, 0.0  ;;  %622 = vmatpush.msrb.mxu2 %v1828_v58 }
  0xa8   :  { %551 = vmatpush.msrb.mxu1 %v2133_v9 }
  0xa9   :  { %643 = vmatpush.msra.mxu3 %v2060_v49  ;;  %623 = vmatpush.msrb.mxu2 %v1844_v62 }
  0xaa   :  { %552 = vmatpush.msrb.mxu1 %v2145_v35  ;;  %v400_v35 = vpop.f32.mrf.mxu0 }
  0xab   :  { %211 = vmatmul.f32.gmra.mxu1 %v123_v33  ;;  %252 = vmatmul.f32.gmra.mxu2 %v123_v33 }
  0xac   :  { %293 = vmatmul.f32.gmra.mxu3 %v123_v33  ;;  %624 = vmatpush.msrb.mxu2 %v1860_v2 }
  0xad   :  { %644 = vmatpush.msra.mxu3 %v2080_v56 }
  0xae   :  { %625 = vmatpush.msrb.mxu2 %v1875_v6 }
  0xaf   :  { %645 = vmatpush.msra.mxu3 %v2090_v59 }
  0xb0   :  { %626 = vmatpush.msrb.mxu2 %v1890_v11 }
  0xb1   :  { %646 = vmatpush.msra.mxu3 %v2111_v4 }
  0xb2   :  { %627 = vmatpush.msrb.mxu2 %v1901_v13 }
  0xb3   :  { %214 = vmatmul.f32.gmra.mxu1 %v124_v43  ;;  %255 = vmatmul.f32.gmra.mxu2 %v124_v43 }
  0xb4   :  { %296 = vmatmul.f32.gmra.mxu3 %v124_v43 }
  0xb5   :  { %647 = vmatpush.msra.mxu3 %v2128_v8 }
  0xbb   :  { %217 = vmatmul.f32.gmra.mxu1 %v125_v51  ;;  %258 = vmatmul.f32.gmra.mxu2 %v125_v51 }
  0xbc   :  { %299 = vmatmul.f32.gmra.mxu3 %v125_v51 }
  0xc3   :  { %220 = vmatmul.f32.gmra.mxu1 %v126_v55  ;;  %261 = vmatmul.f32.gmra.mxu2 %v126_v55 }
  0xc4   :  { %302 = vmatmul.f32.gmra.mxu3 %v126_v55 }
  0xcb   :  { %419 = vmatmul.f32.vlgmr.msra.gmra.mxu1 %v1906_v15  ;;  %439 = vmatmul.f32.vlgmr.msra.gmra.mxu2 %v1906_v15 }
  0xcc   :  { %727 = vmatpush.msra.mxu1 %v1648_v10  ;;  %747 = vmatpush.msra.mxu2 %v1896_v12 }
  0xce   :  { %728 = vmatpush.msra.mxu1 %v1664_v14  ;;  %748 = vmatpush.msra.mxu2 %v1918_v16 }
  0xd0   :  { %729 = vmatpush.msra.mxu1 %v1679_v18  ;;  %749 = vmatpush.msra.mxu2 %v1926_v17 }
  0xd2   :  { %730 = vmatpush.msra.mxu1 %v1707_v26  ;;  %750 = vmatpush.msra.mxu2 %v1942_v20 }
  0xd4   :  { %731 = vmatpush.msra.mxu1 %v1723_v30  ;;  %751 = vmatpush.msra.mxu2 %v1956_v22 }
  0xd6   :  { %732 = vmatpush.msra.mxu1 %v1738_v34  ;;  %752 = vmatpush.msra.mxu2 %v1971_v24 }
  0xd8   :  { %733 = vmatpush.msra.mxu1 %v1760_v40  ;;  %753 = vmatpush.msra.mxu2 %v1990_v28 }
  0xda   :  { %734 = vmatpush.msra.mxu1 %v1776_v44  ;;  %754 = vmatpush.msra.mxu2 %v2000_v31 }
  0xdc   :  { %735 = vmatpush.msra.mxu1 %v1791_v48  ;;  %755 = vmatpush.msra.mxu2 %v2020_v37 }
  0xde   :  { %736 = vmatpush.msra.mxu1 %v1806_v52  ;;  %756 = vmatpush.msra.mxu2 %v2030_v39 }
  0xe0   :  { %737 = vmatpush.msra.mxu1 %v1828_v58  ;;  %757 = vmatpush.msra.mxu2 %v2050_v46 }
  0xe2   :  { %738 = vmatpush.msra.mxu1 %v1844_v62  ;;  %758 = vmatpush.msra.mxu2 %v2060_v49 }
  0xe4   :  { %739 = vmatpush.msra.mxu1 %v1860_v2  ;;  %759 = vmatpush.msra.mxu2 %v2080_v56 }
  0xe6   :  { %740 = vmatpush.msra.mxu1 %v1875_v6  ;;  %760 = vmatpush.msra.mxu2 %v2090_v59 }
  0xe8   :  { %741 = vmatpush.msra.mxu1 %v1890_v11  ;;  %761 = vmatpush.msra.mxu2 %v2111_v4 }
  0xea   :  { %742 = vmatpush.msra.mxu1 %v1901_v13  ;;  %762 = vmatpush.msra.mxu2 %v2128_v8 }
 0x108   :  { %v200_v27 = vpop.f32.mrf.mxu1 }
 0x109   :  { %v201_v8 = vadd.f32 %v200_v27, %v177_v0 }
 0x10e   :  { %v241_v63 = vpop.f32.mrf.mxu2 }
 0x10f   :  { %v2243_v1 = vpop.f32.mrf.mxu3 }
 0x110   :  { %v203_v3 = vpop.f32.mrf.mxu1 }
 0x111   :  { %v2245_v33 = vadd.f32 %v203_v3, %v177_v0 }
 0x113   :  { %2937 = vst [vmem:[#allocation11_spill] sm:$0xff] %v2245_v33 }
 0x116   :  { %v244_v43 = vpop.f32.mrf.mxu2 }
 0x117   :  { %v2249_v45 = vadd.f32 %v244_v43, %v178_v36  ;;  %v285_v51 = vpop.f32.mrf.mxu3  ;;  %v449_v43 = vadd.f32 %v400_v35, %v201_v8 }
 0x118   :  { %v2252_v53 = vadd.f32 %v285_v51, %v2247_v42  ;;  %v206_v54 = vpop.f32.mrf.mxu1 }
 0x119   :  { %2938 = vst [vmem:[#allocation12_spill] sm:$0xff] %v2249_v45  ;;  %v2254_v55 = vadd.f32 %v206_v54, %v177_v0  ;;  %v1403_v45 = vmul.f32 -1.442695, %v449_v43 }
 0x11a   :  { %2939 = vst [vmem:[#allocation13_spill] sm:$0xff] %v2252_v53 }
 0x11b   :  { %2940 = vst [vmem:[#allocation14_spill] sm:$0xff] %v2254_v55  ;;  %1426 = vpow2.f32 %v1403_v45 }
 0x11e   :  { %v247_v13 = vpop.f32.mrf.mxu2 }
 0x11f   :  { %v2256_v4 = vadd.f32 %v247_v13, %v178_v36  ;;  %v288_v3 = vpop.f32.mrf.mxu3 }
 0x120   :  { %v2259_v33 = vadd.f32 %v288_v3, %v2247_v42  ;;  %v209_v61 = vpop.f32.mrf.mxu1 }
 0x121   :  { %2941 = vst [vmem:[#allocation15_spill] sm:$0xff] %v2256_v4  ;;  %v2261_v11 = vadd.f32 %v209_v61, %v177_v0 }
 0x122   :  { %2942 = vst [vmem:[#allocation16_spill] sm:$0xff] %v2259_v33  ;;  %v1427_v33 = vpop.eup %1426 }
 0x123   :  { %2943 = vst [vmem:[#allocation17_spill] sm:$0xff] %v2261_v11  ;;  %v242_v11 = vadd.f32 %v241_v63, %v178_v36 }
 0x126   :  { %v250_v9 = vpop.f32.mrf.mxu2 }
 0x127   :  { %v2263_v51 = vadd.f32 %v250_v9, %v178_v36  ;;  %v291_v53 = vpop.f32.mrf.mxu3  ;;  %v457_v9 = vadd.f32 1.0, %v1427_v33 }
 0x128   :  { %v2266_v54 = vadd.f32 %v291_v53, %v2247_v42  ;;  %v212_v27 = vpop.f32.mrf.mxu1 }
 0x129   :  { %2944 = vst [vmem:[#allocation18_spill] sm:$0xff] %v2263_v51  ;;  %v2268_v55 = vadd.f32 %v212_v27, %v177_v0  ;;  %1428 = vrcp.f32 %v457_v9  ;;  %vm464_vm2 = vweird.f32 %v457_v9 }
 0x12a   :  { %2945 = vst [vmem:[#allocation19_spill] sm:$0xff] %v2266_v54 }
 0x12b   :  { %2946 = vst [vmem:[#allocation20_spill] sm:$0xff] %v2268_v55 }
 0x12e   :  { %v253_v13 = vpop.f32.mrf.mxu2 }
 0x12f   :  { %v2270_v4 = vadd.f32 %v253_v13, %v178_v36  ;;  %v294_v3 = vpop.f32.mrf.mxu3 }
 0x130   :  { %v2273_v61 = vadd.f32 %v294_v3, %v2247_v42  ;;  %v215_v8 = vpop.f32.mrf.mxu1 }
 0x131   :  { %2947 = vst [vmem:[#allocation21_spill] sm:$0xff] %v2270_v4  ;;  %v2275_v35 = vadd.f32 %v215_v8, %v177_v0  ;;  %v1429_v4 = vpop.eup %1428 }
 0x132   :  { %2948 = vst [vmem:[#allocation22_spill] sm:$0xff] %v2273_v61  ;;  %vm465_vm1 = vweird.f32 %v1429_v4 }
 0x133   :  { %2949 = vst [vmem:[#allocation23_spill] sm:$0xff] %v2275_v35  ;;  %v460_v35 = vmul.f32 %v1429_v4, %v457_v9  ;;  %vm466_vm3 = vmor %vm464_vm2, %vm465_vm1 }
 0x136   :  { %v256_v43 = vpop.f32.mrf.mxu2 }
 0x137   :  { %v2277_v53 = vadd.f32 %v256_v43, %v178_v36  ;;  %v297_v54 = vpop.f32.mrf.mxu3  ;;  %v461_v43 = vsub.f32 1.0, %v460_v35  ;;  %v468_v35 = vand.u32 2147483647, %v457_v9 }
 0x138   :  { %v2280_v27 = vadd.f32 %v297_v54, %v2247_v42  ;;  %v218_v45 = vpop.f32.mrf.mxu1 }
 0x139   :  { %2950 = vst [vmem:[#allocation24_spill] sm:$0xff] %v2277_v53  ;;  %v2282_v13 = vadd.f32 %v218_v45, %v177_v0  ;;  %v462_v45 = vmul.f32 %v1429_v4, %v461_v43  ;;  %vm469_vm4 = vcmp.eq.f32.partialorder %v468_v35, 8.507059e+37  ;;  %v283_v43 = vadd.f32 %v2243_v1, %v2247_v42 }
 0x13a   :  { %2951 = vst [vmem:[#allocation25_spill] sm:$0xff] %v2280_v27 }
 0x13b   :  { %2952 = vst [vmem:[#allocation26_spill] sm:$0xff] %v2282_v13 }
 0x13e   :  { %v259_v55 = vpop.f32.mrf.mxu2 }
 0x13f   :  { %v2284_v51 = vadd.f32 %v259_v55, %v178_v36  ;;  %v300_v3 = vpop.f32.mrf.mxu3  ;;  %v2296_v55 = vld [vmem:[%s2910_s6] ss:$0 sm:$0xff] }
 0x140   :  { %v2287_v8 = vadd.f32 %v300_v3, %v2247_v42  ;;  %v221_v33 = vpop.f32.mrf.mxu1  ;;  %v463_v3 = vadd.f32 %v1429_v4, %v462_v45 }
 0x141   :  { %2953 = vst [vmem:[#allocation27_spill] sm:$0xff] %v2284_v51  ;;  %v2289_v61 = vadd.f32 %v221_v33, %v177_v0 }
 0x142   :  { %2954 = vst [vmem:[#allocation28_spill] sm:$0xff] %v2287_v8  ;;  %v470_v8 = vand.u32 2147483648, %v457_v9  ;;  %v467_v63 = vsel %vm466_vm3, %v1429_v4, %v463_v3 }
 0x143   :  { %2955 = vst [vmem:[#allocation29_spill] sm:$0xff] %v2289_v61 }
 0x146   :  { %v262_v53 = vpop.f32.mrf.mxu2 }
 0x147   :  { %v2291_v54 = vadd.f32 %v262_v53, %v178_v36  ;;  %v471_v53 = vor.u32 1.1754944e-38, %v470_v8 }
 0x148   :  { %v420_v27 = vpop.f32.mrf.mxu1 }
 0x149   :  { %2956 = vst [vmem:[#allocation30_spill] sm:$0xff] %v2291_v54  ;;  %v450_v13 = vadd.f32 %v420_v27, %v242_v11  ;;  %v472_v27 = vsel %vm469_vm4, %v471_v53, %v467_v63 }
 0x14b   :  { %v1404_v59 = vmul.f32 -1.442695, %v450_v13 }
 0x14d   :  { %1430 = vpow2.f32 %v1404_v59 }
 0x14e   :  { %v440_v0 = vpop.f32.mrf.mxu2 }
 0x14f   :  { %v489_v36 = vadd.f32 %v2296_v55, %v440_v0 }
 0x151   :  { %v490_v33 = vmul.f32 %v489_v36, %v472_v27 }
 0x153   :  { %v1431_v11 = vpop.eup %1430  ;;  %v491_v45 = vadd.f32 %v490_v33, %v283_v43 }
 0x154   :  { %v458_v13 = vadd.f32 1.0, %v1431_v11 }
 0x156   :  { %1432 = vrcp.f32 %v458_v13  ;;  %v485_v9 = vand.u32 2147483648, %v458_v13  ;;  %v483_v4 = vand.u32 2147483647, %v458_v13  ;;  %vm479_vm6 = vweird.f32 %v458_v13 }
 0x157   :  { %1434 = vtanh.f32 %v491_v45 }
 0x158   :  { %v486_v0 = vor.u32 1.1754944e-38, %v485_v9  ;;  %vm484_vm8 = vcmp.eq.f32.partialorder %v483_v4, 8.507059e+37 }
 0x15c   :  { %v1433_v59 = vpop.eup %1432 }
 0x15d   :  { %v475_v54 = vmul.f32 %v1433_v59, %v458_v13  ;;  %vm480_vm5 = vweird.f32 %v1433_v59  ;;  %v1435_v3 = vpop.eup %1434 }
 0x15e   :  { %vm481_vm7 = vmor %vm479_vm6, %vm480_vm5  ;;  %v493_v35 = vsub.f32 %v1906_v15, %v1435_v3  ;;  %v2965_v15 = vld [vmem:[#allocation11_spill] sm:$0xff] }
 0x15f   :  { %v476_v61 = vsub.f32 1.0, %v475_v54 }
 0x161   :  { %v477_v51 = vmul.f32 %v1433_v59, %v476_v61 }
 0x163   :  { %v478_v8 = vadd.f32 %v1433_v59, %v477_v51 }
 0x165   :  { %v482_v63 = vsel %vm481_vm7, %v1433_v59, %v478_v8 }
 0x166   :  { %v487_v1 = vsel %vm484_vm8, %v486_v0, %v482_v63 }
 0x167   :  { %v494_v36 = vmul.f32 %v493_v35, %v487_v1 }
 0x169   :  { %v2302_v53 = vadd.f32 %v1435_v3, %v494_v36 }
 0x16b   :  { %513 = vmatmul.f32.vlgmr.msrb.gmra.mxu3 %v2302_v53  ;;  %533 = vmatmul.f32.vlgmr.msrb.gmra.mxu0 %v2302_v53 }
 0x16c   :  { %553 = vmatmul.f32.vlgmr.msrb.gmra.mxu1 %v2302_v53  ;;  %767 = vmatpush.msrb.mxu3 %v1931_v19 }
 0x16d   :  { %842 = vmatpush.msrb.mxu0 %v1648_v10  ;;  %862 = vmatpush.msrb.mxu1 %v1896_v12  ;;  %v2957_v10 = vld [vmem:[#allocation6_spill] sm:$0xff] }
 0x16e   :  { %768 = vmatpush.msrb.mxu3 %v1947_v21 }
 0x16f   :  { %843 = vmatpush.msrb.mxu0 %v1664_v14  ;;  %863 = vmatpush.msrb.mxu1 %v1918_v16  ;;  %v2958_v14 = vld [vmem:[#allocation9_spill] sm:$0xff] }
 0x170   :  { %769 = vmatpush.msrb.mxu3 %v1961_v23 }
 0x171   :  { %844 = vmatpush.msrb.mxu0 %v1679_v18  ;;  %864 = vmatpush.msrb.mxu1 %v1926_v17  ;;  %v2959_v18 = vld [vmem:[#allocation4_spill] sm:$0xff] }
 0x172   :  { %770 = vmatpush.msrb.mxu3 %v1976_v25 }
 0x173   :  { %845 = vmatpush.msrb.mxu0 %v1707_v26  ;;  %865 = vmatpush.msrb.mxu1 %v1942_v20  ;;  %v2960_v26 = vld [vmem:[#allocation7_spill] sm:$0xff] }
 0x174   :  { %771 = vmatpush.msrb.mxu3 %v1995_v29 }
 0x175   :  { %846 = vmatpush.msrb.mxu0 %v1723_v30  ;;  %866 = vmatpush.msrb.mxu1 %v1956_v22  ;;  %v2961_v30 = vld [vmem:[#allocation10_spill] sm:$0xff] }
 0x176   :  { %772 = vmatpush.msrb.mxu3 %v2007_v32 }
 0x177   :  { %847 = vmatpush.msrb.mxu0 %v1738_v34  ;;  %867 = vmatpush.msrb.mxu1 %v1971_v24  ;;  %v2962_v34 = vld [vmem:[#allocation5_spill] sm:$0xff] }
 0x178   :  { %773 = vmatpush.msrb.mxu3 %v2025_v38 }
 0x179   :  { %848 = vmatpush.msrb.mxu0 %v1760_v40  ;;  %868 = vmatpush.msrb.mxu1 %v1990_v28  ;;  %v2963_v40 = vld [vmem:[#allocation8_spill] sm:$0xff] }
 0x17a   :  { %774 = vmatpush.msrb.mxu3 %v2037_v41 }
 0x17b   :  { %849 = vmatpush.msrb.mxu0 %v1776_v44  ;;  %869 = vmatpush.msrb.mxu1 %v2000_v31  ;;  %v2355_v44 = vpop.f32.mrf.mxu3 }
 0x17c   :  { %775 = vmatpush.msrb.mxu3 %v2055_v47 }
 0x17d   :  { %850 = vmatpush.msrb.mxu0 %v1791_v48  ;;  %870 = vmatpush.msrb.mxu1 %v2020_v37 }
 0x17e   :  { %776 = vmatpush.msrb.mxu3 %v2067_v50 }
 0x17f   :  { %851 = vmatpush.msrb.mxu0 %v1806_v52  ;;  %871 = vmatpush.msrb.mxu1 %v2030_v39  ;;  %v2964_v52 = vld [vmem:[#allocation12_spill] sm:$0xff] }
 0x180   :  { %777 = vmatpush.msrb.mxu3 %v2085_v57 }
 0x181   :  { %852 = vmatpush.msrb.mxu0 %v1828_v58  ;;  %872 = vmatpush.msrb.mxu1 %v2050_v46 }
 0x182   :  { %778 = vmatpush.msrb.mxu3 %v2097_v60 }
 0x183   :  { %853 = vmatpush.msrb.mxu0 %v1844_v62  ;;  %873 = vmatpush.msrb.mxu1 %v2060_v49 }
 0x184   :  { %779 = vmatpush.msrb.mxu3 %v2116_v5 }
 0x185   :  { %854 = vmatpush.msrb.mxu0 %v1860_v2  ;;  %874 = vmatpush.msrb.mxu1 %v2080_v56 }
 0x186   :  { %780 = vmatpush.msrb.mxu3 %v2121_v7 }
 0x187   :  { %855 = vmatpush.msrb.mxu0 %v1875_v6  ;;  %875 = vmatpush.msrb.mxu1 %v2957_v10 }
 0x188   :  { %781 = vmatpush.msrb.mxu3 %v2958_v14 }
 0x189   :  { %856 = vmatpush.msrb.mxu0 %v2959_v18  ;;  %876 = vmatpush.msrb.mxu1 %v2960_v26 }
 0x18a   :  { %782 = vmatpush.msrb.mxu3 %v2961_v30 }
 0x18b   :  { %857 = vmatpush.msrb.mxu0 %v2962_v34  ;;  %877 = vmatpush.msrb.mxu1 %v2963_v40 }
 0x1e8   :  { %v534_v48 = vpop.f32.mrf.mxu0 }
 0x1e9   :  { %v564_v58 = vadd.f32 %v534_v48, %v2964_v52  ;;  %v554_v0 = vpop.f32.mrf.mxu1 }
 0x1ea   :  { %v603_v36 = vadd.f32 %v2296_v55, %v554_v0 }
 0x1eb   :  { %v1406_v62 = vmul.f32 -1.442695, %v564_v58 }
 0x1ed   :  { %1436 = vpow2.f32 %v1406_v62 }
 0x1ee   :  { %v514_v2 = vpop.f32.mrf.mxu3 }
 0x1ef   :  { %v563_v51 = vadd.f32 %v514_v2, %v2965_v15  ;;  %v2966_v2 = vld [vmem:[#allocation13_spill] sm:$0xff] }
 0x1f1   :  { %v1405_v61 = vmul.f32 -1.442695, %v563_v51 }
 0x1f3   :  { %1438 = vpow2.f32 %v1405_v61  ;;  %v1437_v54 = vpop.eup %1436 }
 0x1f4   :  { %v572_v27 = vadd.f32 1.0, %v1437_v54 }
 0x1f6   :  { %v599_v61 = vand.u32 2147483648, %v572_v27  ;;  %vm593_vm14 = vweird.f32 %v572_v27  ;;  %v597_v54 = vand.u32 2147483647, %v572_v27 }
 0x1f8   :  { %vm598_vm0 = vcmp.eq.f32.partialorder %v597_v54, 8.507059e+37 }
 0x1f9   :  { %v1439_v11 = vpop.eup %1438 }
 0x1fa   :  { %v571_v13 = vadd.f32 1.0, %v1439_v11 }
 0x1fc   :  { %1440 = vrcp.f32 %v571_v13  ;;  %v584_v4 = vand.u32 2147483648, %v571_v13  ;;  %v582_v8 = vand.u32 2147483647, %v571_v13  ;;  %vm578_vm10 = vweird.f32 %v571_v13 }
 0x1fd   :  { %1442 = vrcp.f32 %v572_v27 }
 0x1fe   :  { %v585_v1 = vor.u32 1.1754944e-38, %v584_v4  ;;  %vm583_vm12 = vcmp.eq.f32.partialorder %v582_v8, 8.507059e+37 }
 0x202   :  { %v1441_v33 = vpop.eup %1440 }
 0x203   :  { %v1443_v43 = vpop.eup %1442  ;;  %v574_v45 = vmul.f32 %v1441_v33, %v571_v13  ;;  %vm579_vm9 = vweird.f32 %v1441_v33 }
 0x204   :  { %v589_v9 = vmul.f32 %v1443_v43, %v572_v27  ;;  %vm580_vm11 = vmor %vm578_vm10, %vm579_vm9  ;;  %vm594_vm13 = vweird.f32 %v1443_v43  ;;  %v2371_v27 = vld [vmem:[%s2907_s5 + $0x168] sm:$0xff] }
 0x205   :  { %v575_v59 = vsub.f32 1.0, %v574_v45  ;;  %vm595_vm15 = vmor %vm593_vm14, %vm594_vm13  ;;  %v600_v45 = vor.u32 1.1754944e-38, %v599_v61 }
 0x206   :  { %v590_v63 = vsub.f32 1.0, %v589_v9 }
 0x207   :  { %v576_v3 = vmul.f32 %v1441_v33, %v575_v59 }
 0x208   :  { %v591_v62 = vmul.f32 %v1443_v43, %v590_v63 }
 0x209   :  { %v577_v35 = vadd.f32 %v1441_v33, %v576_v3 }
 0x20a   :  { %v592_v51 = vadd.f32 %v1443_v43, %v591_v62 }
 0x20b   :  { %v581_v48 = vsel %vm580_vm11, %v1441_v33, %v577_v35 }
 0x20c   :  { %v586_v52 = vsel %vm583_vm12, %v585_v1, %v581_v48  ;;  %v596_v11 = vsel %vm595_vm15, %v1443_v43, %v592_v51  ;;  %v2379_v43 = vld [vmem:[%s2907_s5 + $0x150] sm:$0xff] }
 0x20d   :  { %v604_v58 = vmul.f32 %v603_v36, %v586_v52  ;;  %v601_v33 = vsel %vm598_vm0, %v600_v45, %v596_v11 }
 0x20f   :  { %v605_v15 = vadd.f32 %v604_v58, %v2966_v2 }
 0x211   :  { %1444 = vtanh.f32 %v605_v15 }
 0x217   :  { %v1445_v13 = vpop.eup %1444 }
 0x218   :  { %v607_v59 = vsub.f32 %v2302_v53, %v1445_v13 }
 0x21a   :  { %v608_v9 = vmul.f32 %v607_v59, %v601_v33 }
 0x21c   :  { %v2362_v4 = vadd.f32 %v1445_v13, %v608_v9  ;;  %v2969_v13 = vld [vmem:[#allocation16_spill] sm:$0xff] }
 0x21e   :  { %628 = vmatmul.f32.vlgmr.msrb.gmra.mxu2 %v2362_v4  ;;  %648 = vmatmul.f32.vlgmr.msra.gmra.mxu3 %v2362_v4 }
 0x21f   :  { %668 = vmatmul.f32.vlgmr.msra.gmra.mxu0 %v2362_v4  ;;  %882 = vmatpush.msrb.mxu2 %v1931_v19  ;;  %v2387_v19 = vld [vmem:[%s2907_s5 + $0x138] sm:$0xff] }
 0x220   :  { %957 = vmatpush.msra.mxu3 %v2371_v27  ;;  %977 = vmatpush.msra.mxu0 %v1896_v12  ;;  %v2395_v12 = vld [vmem:[%s2907_s5 + $0x120] sm:$0xff] }
 0x221   :  { %883 = vmatpush.msrb.mxu2 %v1947_v21  ;;  %v2427_v21 = vld [vmem:[%s2907_s5 + $0xc0] sm:$0xff] }
 0x222   :  { %958 = vmatpush.msra.mxu3 %v2379_v43  ;;  %978 = vmatpush.msra.mxu0 %v1918_v16  ;;  %v2403_v16 = vld [vmem:[%s2907_s5 + $0x108] sm:$0xff] }
 0x223   :  { %884 = vmatpush.msrb.mxu2 %v1961_v23  ;;  %v2443_v23 = vld [vmem:[%s2907_s5 + $0x90] sm:$0xff] }
 0x224   :  { %959 = vmatpush.msra.mxu3 %v2387_v19  ;;  %979 = vmatpush.msra.mxu0 %v1926_v17  ;;  %v2411_v17 = vld [vmem:[%s2907_s5 + $0xf0] sm:$0xff] }
 0x225   :  { %885 = vmatpush.msrb.mxu2 %v1976_v25  ;;  %v2459_v25 = vld [vmem:[%s2907_s5 + $0x60] sm:$0xff] }
 0x226   :  { %960 = vmatpush.msra.mxu3 %v2395_v12  ;;  %980 = vmatpush.msra.mxu0 %v1942_v20  ;;  %v2419_v20 = vld [vmem:[%s2907_s5 + $0xd8] sm:$0xff] }
 0x227   :  { %886 = vmatpush.msrb.mxu2 %v1995_v29 }
 0x228   :  { %961 = vmatpush.msra.mxu3 %v2403_v16  ;;  %981 = vmatpush.msra.mxu0 %v1956_v22  ;;  %v2435_v22 = vld [vmem:[%s2907_s5 + $0xa8] sm:$0xff] }
 0x229   :  { %887 = vmatpush.msrb.mxu2 %v2007_v32  ;;  %v2967_v32 = vld [vmem:[#allocation14_spill] sm:$0xff] }
 0x22a   :  { %962 = vmatpush.msra.mxu3 %v2411_v17  ;;  %982 = vmatpush.msra.mxu0 %v1971_v24  ;;  %v2451_v24 = vld [vmem:[%s2907_s5 + $0x78] sm:$0xff] }
 0x22b   :  { %888 = vmatpush.msrb.mxu2 %v2025_v38  ;;  %v2968_v38 = vld [vmem:[#allocation15_spill] sm:$0xff] }
 0x22c   :  { %963 = vmatpush.msra.mxu3 %v2419_v20  ;;  %983 = vmatpush.msra.mxu0 %v1990_v28  ;;  %v2467_v28 = vld [vmem:[%s2907_s5 + $0x48] sm:$0xff] }
 0x22d   :  { %889 = vmatpush.msrb.mxu2 %v2037_v41 }
 0x22e   :  { %964 = vmatpush.msra.mxu3 %v2427_v21  ;;  %984 = vmatpush.msra.mxu0 %v2000_v31 }
 0x22f   :  { %890 = vmatpush.msrb.mxu2 %v2055_v47 }
 0x230   :  { %965 = vmatpush.msra.mxu3 %v2435_v22  ;;  %985 = vmatpush.msra.mxu0 %v2020_v37 }
 0x231   :  { %891 = vmatpush.msrb.mxu2 %v2067_v50 }
 0x232   :  { %966 = vmatpush.msra.mxu3 %v2443_v23  ;;  %986 = vmatpush.msra.mxu0 %v2030_v39 }
 0x233   :  { %892 = vmatpush.msrb.mxu2 %v2085_v57 }
 0x234   :  { %967 = vmatpush.msra.mxu3 %v2451_v24  ;;  %987 = vmatpush.msra.mxu0 %v2050_v46 }
 0x235   :  { %893 = vmatpush.msrb.mxu2 %v2097_v60 }
 0x236   :  { %968 = vmatpush.msra.mxu3 %v2459_v25  ;;  %988 = vmatpush.msra.mxu0 %v2060_v49 }
 0x237   :  { %894 = vmatpush.msrb.mxu2 %v2116_v5 }
 0x238   :  { %969 = vmatpush.msra.mxu3 %v2467_v28  ;;  %989 = vmatpush.msra.mxu0 %v2080_v56 }
 0x239   :  { %895 = vmatpush.msrb.mxu2 %v2121_v7 }
 0x23a   :  { %970 = vmatpush.msra.mxu3 %v1875_v6  ;;  %990 = vmatpush.msra.mxu0 %v2957_v10 }
 0x23b   :  { %896 = vmatpush.msrb.mxu2 %v2958_v14 }
 0x23c   :  { %971 = vmatpush.msra.mxu3 %v2959_v18  ;;  %991 = vmatpush.msra.mxu0 %v2960_v26 }
 0x23d   :  { %897 = vmatpush.msrb.mxu2 %v2961_v30 }
 0x23e   :  { %972 = vmatpush.msra.mxu3 %v2962_v34  ;;  %992 = vmatpush.msra.mxu0 %v2963_v40 }
 0x29c   :  { %v669_v52 = vpop.f32.mrf.mxu0 }
 0x29d   :  { %v718_v15 = vadd.f32 %v2296_v55, %v669_v52  ;;  %v2578_v52 = vld [vmem:[%s2907_s5 + $0xe0] sm:$0xff] }
 0x2a1   :  { %v629_v29 = vpop.f32.mrf.mxu2  ;;  %v649_v31 = vpop.f32.mrf.mxu3 }
 0x2a2   :  { %v678_v37 = vadd.f32 %v629_v29, %v2967_v32  ;;  %v679_v6 = vadd.f32 %v649_v31, %v2968_v38 }
 0x2a4   :  { %v1407_v39 = vmul.f32 -1.442695, %v678_v37  ;;  %v1408_v41 = vmul.f32 -1.442695, %v679_v6 }
 0x2a6   :  { %1446 = vpow2.f32 %v1407_v39 }
 0x2a7   :  { %1448 = vpow2.f32 %v1408_v41  ;;  %v2493_v41 = vld [vmem:[%s2907_s5 + $0x178] sm:$0xff] }
 0x2ac   :  { %v1447_v46 = vpop.eup %1446 }
 0x2ad   :  { %v1449_v49 = vpop.eup %1448  ;;  %v686_v18 = vadd.f32 1.0, %v1447_v46  ;;  %v2500_v46 = vld [vmem:[%s2907_s5 + $0x170] sm:$0xff] }
 0x2ae   :  { %v687_v3 = vadd.f32 1.0, %v1449_v49  ;;  %v2506_v49 = vld [vmem:[%s2907_s5 + $0x160] sm:$0xff] }
 0x2af   :  { %1450 = vrcp.f32 %v686_v18  ;;  %v699_v63 = vand.u32 2147483648, %v686_v18  ;;  %v697_v48 = vand.u32 2147483647, %v686_v18  ;;  %vm693_vm2 = vweird.f32 %v686_v18 }
 0x2b0   :  { %1452 = vrcp.f32 %v687_v3  ;;  %v714_v33 = vand.u32 2147483648, %v687_v3  ;;  %vm708_vm6 = vweird.f32 %v687_v3  ;;  %v712_v9 = vand.u32 2147483647, %v687_v3 }
 0x2b1   :  { %v700_v62 = vor.u32 1.1754944e-38, %v699_v63  ;;  %vm698_vm4 = vcmp.eq.f32.partialorder %v697_v48, 8.507059e+37  ;;  %v2552_v63 = vld [vmem:[%s2907_s5 + $0x110] sm:$0xff]  ;;  %v2571_v48 = vld [vmem:[%s2907_s5 + $0xe8] sm:$0xff] }
 0x2b2   :  { %v715_v32 = vor.u32 1.1754944e-38, %v714_v33  ;;  %vm713_vm8 = vcmp.eq.f32.partialorder %v712_v9, 8.507059e+37 }
 0x2b5   :  { %v1451_v8 = vpop.eup %1450 }
 0x2b6   :  { %v1453_v34 = vpop.eup %1452  ;;  %v689_v0 = vmul.f32 %v1451_v8, %v686_v18  ;;  %vm694_vm1 = vweird.f32 %v1451_v8  ;;  %v2513_v18 = vld [vmem:[%s2907_s5 + $0x158] sm:$0xff] }
 0x2b7   :  { %v704_v1 = vmul.f32 %v1453_v34, %v687_v3  ;;  %vm695_vm3 = vmor %vm693_vm2, %vm694_vm1  ;;  %vm709_vm5 = vweird.f32 %v1453_v34  ;;  %v2519_v3 = vld [vmem:[%s2907_s5 + $0x148] sm:$0xff] }
 0x2b8   :  { %v690_v35 = vsub.f32 1.0, %v689_v0  ;;  %vm710_vm7 = vmor %vm708_vm6, %vm709_vm5  ;;  %v2539_v0 = vld [vmem:[%s2907_s5 + $0x128] sm:$0xff] }
 0x2b9   :  { %v705_v2 = vsub.f32 1.0, %v704_v1  ;;  %v2558_v1 = vld [vmem:[%s2907_s5 + $0x100] sm:$0xff] }
 0x2ba   :  { %v691_v36 = vmul.f32 %v1451_v8, %v690_v35  ;;  %v2545_v35 = vld [vmem:[%s2907_s5 + $0x118] sm:$0xff] }
 0x2bb   :  { %v706_v11 = vmul.f32 %v1453_v34, %v705_v2  ;;  %v2599_v2 = vld [vmem:[%s2907_s5 + $0xb0] sm:$0xff] }
 0x2bc   :  { %v692_v58 = vadd.f32 %v1451_v8, %v691_v36  ;;  %v2565_v36 = vld [vmem:[%s2907_s5 + $0xf8] sm:$0xff] }
 0x2bd   :  { %v707_v59 = vadd.f32 %v1453_v34, %v706_v11 }
 0x2be   :  { %v696_v51 = vsel %vm695_vm3, %v1451_v8, %v692_v58  ;;  %v2526_v8 = vld [vmem:[%s2907_s5 + $0x140] sm:$0xff]  ;;  %v2584_v58 = vld [vmem:[%s2907_s5 + $0xd0] sm:$0xff] }
 0x2bf   :  { %v701_v61 = vsel %vm698_vm4, %v700_v62, %v696_v51  ;;  %v711_v29 = vsel %vm710_vm7, %v1453_v34, %v707_v59  ;;  %v2532_v34 = vld [vmem:[%s2907_s5 + $0x130] sm:$0xff]  ;;  %v2591_v62 = vld [vmem:[%s2907_s5 + $0xc8] sm:$0xff] }
 0x2c0   :  { %v719_v54 = vmul.f32 %v718_v15, %v701_v61  ;;  %v716_v38 = vsel %vm713_vm8, %v715_v32, %v711_v29  ;;  %v2607_v15 = vld [vmem:[%s2907_s5 + $0x98] sm:$0xff]  ;;  %v2971_v61 = vld [vmem:[#allocation18_spill] sm:$0xff] }
 0x2c2   :  { %v720_v45 = vadd.f32 %v719_v54, %v2969_v13 }
 0x2c4   :  { %1454 = vtanh.f32 %v720_v45 }
 0x2ca   :  { %v1455_v31 = vpop.eup %1454 }
 0x2cb   :  { %v722_v37 = vsub.f32 %v2362_v4, %v1455_v31 }
 0x2cd   :  { %v723_v6 = vmul.f32 %v722_v37, %v716_v38 }
 0x2cf   :  { %v2485_v39 = vadd.f32 %v1455_v31, %v723_v6 }
 0x2d1   :  { %743 = vmatmul.f32.vlgmr.msra.gmra.mxu1 %v2485_v39  ;;  %763 = vmatmul.f32.vlgmr.msra.gmra.mxu2 %v2485_v39 }
 0x2d2   :  { %783 = vmatmul.f32.vlgmr.msrb.gmra.mxu3 %v2485_v39  ;;  %997 = vmatpush.msra.mxu1 %v2493_v41 }
 0x2d3   :  { %1072 = vmatpush.msra.mxu2 %v2371_v27  ;;  %1092 = vmatpush.msrb.mxu3 %v2500_v46 }
 0x2d4   :  { %998 = vmatpush.msra.mxu1 %v2506_v49 }
 0x2d5   :  { %1073 = vmatpush.msra.mxu2 %v2379_v43  ;;  %1093 = vmatpush.msrb.mxu3 %v2513_v18 }
 0x2d6   :  { %999 = vmatpush.msra.mxu1 %v2519_v3 }
 0x2d7   :  { %1074 = vmatpush.msra.mxu2 %v2387_v19  ;;  %1094 = vmatpush.msrb.mxu3 %v2526_v8 }
 0x2d8   :  { %1000 = vmatpush.msra.mxu1 %v2532_v34 }
 0x2d9   :  { %1075 = vmatpush.msra.mxu2 %v2395_v12  ;;  %1095 = vmatpush.msrb.mxu3 %v2539_v0 }
 0x2da   :  { %1001 = vmatpush.msra.mxu1 %v2545_v35 }
 0x2db   :  { %1076 = vmatpush.msra.mxu2 %v2403_v16  ;;  %1096 = vmatpush.msrb.mxu3 %v2552_v63 }
 0x2dc   :  { %1002 = vmatpush.msra.mxu1 %v2558_v1 }
 0x2dd   :  { %1077 = vmatpush.msra.mxu2 %v2411_v17  ;;  %1097 = vmatpush.msrb.mxu3 %v2565_v36 }
 0x2de   :  { %1003 = vmatpush.msra.mxu1 %v2571_v48 }
 0x2df   :  { %1078 = vmatpush.msra.mxu2 %v2419_v20  ;;  %1098 = vmatpush.msrb.mxu3 %v2578_v52 }
 0x2e0   :  { %1004 = vmatpush.msra.mxu1 %v2584_v58 }
 0x2e1   :  { %1079 = vmatpush.msra.mxu2 %v2427_v21  ;;  %1099 = vmatpush.msrb.mxu3 %v2591_v62 }
 0x2e2   :  { %1005 = vmatpush.msra.mxu1 %v2055_v47  ;;  %v2615_v47 = vld [vmem:[%s2907_s5 + $0x80] sm:$0xff] }
 0x2e3   :  { %1080 = vmatpush.msra.mxu2 %v2435_v22  ;;  %1100 = vmatpush.msrb.mxu3 %v2599_v2 }
 0x2e4   :  { %1006 = vmatpush.msra.mxu1 %v2067_v50  ;;  %v2623_v50 = vld [vmem:[%s2907_s5 + $0x68] sm:$0xff] }
 0x2e5   :  { %1081 = vmatpush.msra.mxu2 %v2443_v23  ;;  %1101 = vmatpush.msrb.mxu3 %v2607_v15 }
 0x2e6   :  { %1007 = vmatpush.msra.mxu1 %v2085_v57  ;;  %v2633_v57 = vld [vmem:[%s2907_s5 + $0x30] sm:$0xff] }
 0x2e7   :  { %1082 = vmatpush.msra.mxu2 %v2451_v24  ;;  %1102 = vmatpush.msrb.mxu3 %v2615_v47 }
 0x2e8   :  { %1008 = vmatpush.msra.mxu1 %v2097_v60  ;;  %v2641_v60 = vld [vmem:[%s2907_s5 + $0x18] sm:$0xff] }
 0x2e9   :  { %1083 = vmatpush.msra.mxu2 %v2459_v25  ;;  %1103 = vmatpush.msrb.mxu3 %v2623_v50 }
 0x2ea   :  { %1009 = vmatpush.msra.mxu1 %v2116_v5 }
 0x2eb   :  { %1084 = vmatpush.msra.mxu2 %v2467_v28  ;;  %1104 = vmatpush.msrb.mxu3 %v2080_v56  ;;  %v2649_v56 = vld [vmem:[%s2907_s5] sm:$0xff] }
 0x2ec   :  { %1010 = vmatpush.msra.mxu1 %v2121_v7  ;;  %v2970_v7 = vld [vmem:[#allocation17_spill] sm:$0xff] }
 0x2ed   :  { %1085 = vmatpush.msra.mxu2 %v2633_v57  ;;  %1105 = vmatpush.msrb.mxu3 %v2957_v10 }
 0x2ee   :  { %1011 = vmatpush.msra.mxu1 %v2958_v14 }
 0x2ef   :  { %1086 = vmatpush.msra.mxu2 %v2641_v60  ;;  %1106 = vmatpush.msrb.mxu3 %v2960_v26 }
 0x2f0   :  { %1012 = vmatpush.msra.mxu1 %v2961_v30 }
 0x2f1   :  { %1087 = vmatpush.msra.mxu2 %v2649_v56  ;;  %1107 = vmatpush.msrb.mxu3 %v2963_v40 }
 0x34e   :  { %v744_v5 = vpop.f32.mrf.mxu1 }
 0x34f   :  { %v793_v10 = vadd.f32 %v744_v5, %v2970_v7 }
 0x351   :  { %v1409_v14 = vmul.f32 -1.442695, %v793_v10 }
 0x353   :  { %1456 = vpow2.f32 %v1409_v14 }
 0x354   :  { %v764_v51 = vpop.f32.mrf.mxu2 }
 0x355   :  { %v794_v54 = vadd.f32 %v764_v51, %v2971_v61  ;;  %v784_v37 = vpop.f32.mrf.mxu3 }
 0x356   :  { %v833_v14 = vadd.f32 %v2296_v55, %v784_v37 }
 0x357   :  { %v1410_v26 = vmul.f32 -1.442695, %v794_v54 }
 0x359   :  { %v1457_v11 = vpop.eup %1456  ;;  %1458 = vpow2.f32 %v1410_v26  ;;  %v2972_v26 = vld [vmem:[#allocation19_spill] sm:$0xff] }
 0x35a   :  { %v801_v30 = vadd.f32 1.0, %v1457_v11 }
 0x35c   :  { %1460 = vrcp.f32 %v801_v30  ;;  %v814_v40 = vand.u32 2147483648, %v801_v30  ;;  %v812_v31 = vand.u32 2147483647, %v801_v30  ;;  %vm808_vm10 = vweird.f32 %v801_v30 }
 0x35e   :  { %v815_v5 = vor.u32 1.1754944e-38, %v814_v40  ;;  %vm813_vm12 = vcmp.eq.f32.partialorder %v812_v31, 8.507059e+37 }
 0x35f   :  { %v1459_v13 = vpop.eup %1458 }
 0x360   :  { %v802_v45 = vadd.f32 1.0, %v1459_v13 }
 0x362   :  { %v1461_v59 = vpop.eup %1460  ;;  %1462 = vrcp.f32 %v802_v45  ;;  %vm823_vm14 = vweird.f32 %v802_v45 }
 0x363   :  { %v804_v33 = vmul.f32 %v1461_v59, %v801_v30  ;;  %vm809_vm9 = vweird.f32 %v1461_v59 }
 0x364   :  { %vm810_vm11 = vmor %vm808_vm10, %vm809_vm9 }
 0x365   :  { %v805_v9 = vsub.f32 1.0, %v804_v33  ;;  %v829_v33 = vand.u32 2147483648, %v802_v45 }
 0x367   :  { %v806_v29 = vmul.f32 %v1461_v59, %v805_v9  ;;  %v827_v9 = vand.u32 2147483647, %v802_v45  ;;  %v830_v40 = vor.u32 1.1754944e-38, %v829_v33  ;;  %v2975_v33 = vld [vmem:[#allocation22_spill] sm:$0xff] }
 0x368   :  { %v1463_v32 = vpop.eup %1462 }
 0x369   :  { %v819_v38 = vmul.f32 %v1463_v32, %v802_v45  ;;  %v807_v6 = vadd.f32 %v1461_v59, %v806_v29  ;;  %vm824_vm13 = vweird.f32 %v1463_v32  ;;  %vm828_vm0 = vcmp.eq.f32.partialorder %v827_v9, 8.507059e+37 }
 0x36a   :  { %vm825_vm15 = vmor %vm823_vm14, %vm824_vm13 }
 0x36b   :  { %v820_v7 = vsub.f32 1.0, %v819_v38  ;;  %v811_v10 = vsel %vm810_vm11, %v1461_v59, %v807_v6 }
 0x36c   :  { %v816_v51 = vsel %vm813_vm12, %v815_v5, %v811_v10 }
 0x36d   :  { %v834_v61 = vmul.f32 %v833_v14, %v816_v51  ;;  %v821_v54 = vmul.f32 %v1463_v32, %v820_v7 }
 0x36f   :  { %v835_v11 = vadd.f32 %v834_v61, %v2972_v26  ;;  %v822_v13 = vadd.f32 %v1463_v32, %v821_v54 }
 0x371   :  { %1464 = vtanh.f32 %v835_v11  ;;  %v826_v30 = vsel %vm825_vm15, %v1463_v32, %v822_v13 }
 0x372   :  { %v831_v31 = vsel %vm828_vm0, %v830_v40, %v826_v30 }
 0x377   :  { %v1465_v29 = vpop.eup %1464 }
 0x378   :  { %v837_v59 = vsub.f32 %v2485_v39, %v1465_v29 }
 0x37a   :  { %v838_v37 = vmul.f32 %v837_v59, %v831_v31 }
 0x37c   :  { %v2658_v38 = vadd.f32 %v1465_v29, %v838_v37 }
 0x37e   :  { %858 = vmatmul.f32.vlgmr.msrb.gmra.mxu0 %v2658_v38  ;;  %878 = vmatmul.f32.vlgmr.msrb.gmra.mxu1 %v2658_v38 }
 0x37f   :  { %898 = vmatmul.f32.vlgmr.msrb.gmra.mxu2 %v2658_v38  ;;  %1112 = vmatpush.msrb.mxu0 %v2493_v41 }
 0x380   :  { %1187 = vmatpush.msrb.mxu1 %v2371_v27  ;;  %1207 = vmatpush.msrb.mxu2 %v2500_v46  ;;  %v2690_v27 = vld [vmem:[%s2907_s5 + $0xb8] sm:$0xff] }
 0x381   :  { %1113 = vmatpush.msrb.mxu0 %v2506_v49 }
 0x382   :  { %1188 = vmatpush.msrb.mxu1 %v2379_v43  ;;  %1208 = vmatpush.msrb.mxu2 %v2513_v18  ;;  %v2698_v43 = vld [vmem:[%s2907_s5 + $0xa0] sm:$0xff] }
 0x383   :  { %1114 = vmatpush.msrb.mxu0 %v2519_v3  ;;  %v2973_v18 = vld [vmem:[#allocation20_spill] sm:$0xff] }
 0x384   :  { %1189 = vmatpush.msrb.mxu1 %v2387_v19  ;;  %1209 = vmatpush.msrb.mxu2 %v2526_v8  ;;  %v2706_v19 = vld [vmem:[%s2907_s5 + $0x88] sm:$0xff] }
 0x385   :  { %1115 = vmatpush.msrb.mxu0 %v2532_v34 }
 0x386   :  { %1190 = vmatpush.msrb.mxu1 %v2395_v12  ;;  %1210 = vmatpush.msrb.mxu2 %v2539_v0  ;;  %v2714_v12 = vld [vmem:[%s2907_s5 + $0x70] sm:$0xff]  ;;  %v2974_v0 = vld [vmem:[#allocation21_spill] sm:$0xff] }
 0x387   :  { %1116 = vmatpush.msrb.mxu0 %v2545_v35 }
 0x388   :  { %1191 = vmatpush.msrb.mxu1 %v2403_v16  ;;  %1211 = vmatpush.msrb.mxu2 %v2552_v63  ;;  %v2722_v16 = vld [vmem:[%s2907_s5 + $0x58] sm:$0xff] }
 0x389   :  { %1117 = vmatpush.msrb.mxu0 %v2558_v1 }
 0x38a   :  { %1192 = vmatpush.msrb.mxu1 %v2411_v17  ;;  %1212 = vmatpush.msrb.mxu2 %v2565_v36  ;;  %v1547_v17 = vld [vmem:[%s2907_s5 + $0x50] sm:$0xff] }
 0x38b   :  { %1118 = vmatpush.msrb.mxu0 %v2571_v48 }
 0x38c   :  { %1193 = vmatpush.msrb.mxu1 %v2419_v20  ;;  %1213 = vmatpush.msrb.mxu2 %v2578_v52  ;;  %v2732_v20 = vld [vmem:[%s2907_s5 + $0x40] sm:$0xff] }
 0x38d   :  { %1119 = vmatpush.msrb.mxu0 %v2584_v58 }
 0x38e   :  { %1194 = vmatpush.msrb.mxu1 %v2427_v21  ;;  %1214 = vmatpush.msrb.mxu2 %v2591_v62  ;;  %v1549_v21 = vld [vmem:[%s2907_s5 + $0x38] sm:$0xff] }
 0x38f   :  { %1120 = vmatpush.msrb.mxu0 %v2690_v27 }
 0x390   :  { %1195 = vmatpush.msrb.mxu1 %v2435_v22  ;;  %1215 = vmatpush.msrb.mxu2 %v2599_v2  ;;  %v2742_v22 = vld [vmem:[%s2907_s5 + $0x28] sm:$0xff] }
 0x391   :  { %1121 = vmatpush.msrb.mxu0 %v2698_v43 }
 0x392   :  { %1196 = vmatpush.msrb.mxu1 %v2443_v23  ;;  %1216 = vmatpush.msrb.mxu2 %v2607_v15  ;;  %v1551_v23 = vld [vmem:[%s2907_s5 + $0x20] sm:$0xff] }
 0x393   :  { %1122 = vmatpush.msrb.mxu0 %v2706_v19 }
 0x394   :  { %1197 = vmatpush.msrb.mxu1 %v2451_v24  ;;  %1217 = vmatpush.msrb.mxu2 %v2615_v47  ;;  %v2752_v24 = vld [vmem:[%s2907_s5 + $0x10] sm:$0xff] }
 0x395   :  { %1123 = vmatpush.msrb.mxu0 %v2714_v12 }
 0x396   :  { %1198 = vmatpush.msrb.mxu1 %v2459_v25  ;;  %1218 = vmatpush.msrb.mxu2 %v2623_v50  ;;  %v1553_v25 = vld [vmem:[%s2907_s5 + $0x8] sm:$0xff] }
 0x397   :  { %1124 = vmatpush.msrb.mxu0 %v2722_v16 }
 0x398   :  { %1199 = vmatpush.msrb.mxu1 %v2467_v28  ;;  %1219 = vmatpush.msrb.mxu2 %v1547_v17 }
 0x399   :  { %1125 = vmatpush.msrb.mxu0 %v2732_v20 }
 0x39a   :  { %1200 = vmatpush.msrb.mxu1 %v2633_v57  ;;  %1220 = vmatpush.msrb.mxu2 %v1549_v21 }
 0x39b   :  { %1126 = vmatpush.msrb.mxu0 %v2742_v22 }
 0x39c   :  { %1201 = vmatpush.msrb.mxu1 %v2641_v60  ;;  %1221 = vmatpush.msrb.mxu2 %v1551_v23 }
 0x39d   :  { %1127 = vmatpush.msrb.mxu0 %v2752_v24 }
 0x39e   :  { %1202 = vmatpush.msrb.mxu1 %v2649_v56  ;;  %1222 = vmatpush.msrb.mxu2 %v1553_v25  ;;  %v1318_v25 = vld [vmem:[%s2912_s7 + $0x38] sm:$0xff] }
 0x3fb   :  { %v859_v28 = vpop.f32.mrf.mxu0  ;;  %v879_v46 = vpop.f32.mrf.mxu1 }
 0x3fc   :  { %v908_v8 = vadd.f32 %v859_v28, %v2973_v18  ;;  %v909_v63 = vadd.f32 %v879_v46, %v2974_v0  ;;  %v1317_v46 = vld [vmem:[%s2912_s7 + $0x30] sm:$0xff]  ;;  %v1316_v0 = vld [vmem:[%s2912_s7 + $0x28] sm:$0xff] }
 0x3fe   :  { %v1411_v36 = vmul.f32 -1.442695, %v908_v8  ;;  %v1412_v52 = vmul.f32 -1.442695, %v909_v63 }
 0x400   :  { %1466 = vpow2.f32 %v1411_v36  ;;  %v1315_v36 = vld [vmem:[%s2912_s7 + $0x20] sm:$0xff] }
 0x401   :  { %1468 = vpow2.f32 %v1412_v52  ;;  %v1314_v52 = vld [vmem:[%s2912_s7 + $0x18] sm:$0xff] }
 0x402   :  { %v899_v7 = vpop.f32.mrf.mxu2 }
 0x403   :  { %v948_v54 = vadd.f32 %v2296_v55, %v899_v7 }
 0x406   :  { %v1467_v62 = vpop.eup %1466 }
 0x407   :  { %v1469_v2 = vpop.eup %1468  ;;  %v916_v15 = vadd.f32 1.0, %v1467_v62  ;;  %v1313_v62 = vld [vmem:[%s2912_s7 + $0x10] sm:$0xff] }
 0x408   :  { %v917_v47 = vadd.f32 1.0, %v1469_v2  ;;  %v1312_v2 = vld [vmem:[%s2912_s7 + $0x8] sm:$0xff] }
 0x409   :  { %1470 = vrcp.f32 %v916_v15  ;;  %v929_v32 = vand.u32 2147483648, %v916_v15  ;;  %v927_v5 = vand.u32 2147483647, %v916_v15  ;;  %vm923_vm2 = vweird.f32 %v916_v15 }
 0x40a   :  { %1472 = vrcp.f32 %v917_v47  ;;  %v944_v29 = vand.u32 2147483648, %v917_v47  ;;  %vm938_vm6 = vweird.f32 %v917_v47  ;;  %v942_v40 = vand.u32 2147483647, %v917_v47 }
 0x40b   :  { %v930_v51 = vor.u32 1.1754944e-38, %v929_v32  ;;  %vm928_vm4 = vcmp.eq.f32.partialorder %v927_v5, 8.507059e+37 }
 0x40c   :  { %v945_v37 = vor.u32 1.1754944e-38, %v944_v29  ;;  %vm943_vm8 = vcmp.eq.f32.partialorder %v942_v40, 8.507059e+37 }
 0x40f   :  { %v1471_v50 = vpop.eup %1470 }
 0x410   :  { %v1473_v57 = vpop.eup %1472  ;;  %v919_v60 = vmul.f32 %v1471_v50, %v916_v15  ;;  %vm924_vm1 = vweird.f32 %v1471_v50 }
 0x411   :  { %v934_v45 = vmul.f32 %v1473_v57, %v917_v47  ;;  %vm925_vm3 = vmor %vm923_vm2, %vm924_vm1  ;;  %vm939_vm5 = vweird.f32 %v1473_v57 }
 0x412   :  { %v920_v56 = vsub.f32 1.0, %v919_v60  ;;  %vm940_vm7 = vmor %vm938_vm6, %vm939_vm5 }
 0x413   :  { %v935_v14 = vsub.f32 1.0, %v934_v45 }
 0x414   :  { %v921_v6 = vmul.f32 %v1471_v50, %v920_v56 }
 0x415   :  { %v936_v13 = vmul.f32 %v1473_v57, %v935_v14 }
 0x416   :  { %v922_v10 = vadd.f32 %v1471_v50, %v921_v6 }
 0x417   :  { %v937_v30 = vadd.f32 %v1473_v57, %v936_v13 }
 0x418   :  { %v926_v61 = vsel %vm925_vm3, %v1471_v50, %v922_v10 }
 0x419   :  { %v931_v26 = vsel %vm928_vm4, %v930_v51, %v926_v61  ;;  %v941_v59 = vsel %vm940_vm7, %v1473_v57, %v937_v30  ;;  %v1311_v57 = vld [vmem:[%s2912_s7] sm:$0xff] }
 0x41a   :  { %v949_v11 = vmul.f32 %v948_v54, %v931_v26  ;;  %v946_v21 = vsel %vm943_vm8, %v945_v37, %v941_v59  ;;  %v2838_v51 = vld [vmem:[%s2910_s6] ss:$0 sm:$0xff] }
 0x41c   :  { %v950_v9 = vadd.f32 %v949_v11, %v2975_v33  ;;  %v2978_v33 = vld [vmem:[#allocation25_spill] sm:$0xff] }
 0x41e   :  { %1474 = vtanh.f32 %v950_v9 }
 0x424   :  { %v1475_v31 = vpop.eup %1474 }
 0x425   :  { %v952_v17 = vsub.f32 %v2658_v38, %v1475_v31 }
 0x427   :  { %v953_v55 = vmul.f32 %v952_v17, %v946_v21 }
 0x429   :  { %v2764_v23 = vadd.f32 %v1475_v31, %v953_v55 }
 0x42b   :  { %973 = vmatmul.f32.vlgmr.msra.gmra.mxu3 %v2764_v23  ;;  %993 = vmatmul.f32.vlgmr.msra.gmra.mxu0 %v2764_v23 }
 0x42c   :  { %1013 = vmatmul.f32.vlgmr.msra.gmra.mxu1 %v2764_v23  ;;  %1227 = vmatpush.msra.mxu3 %v2493_v41  ;;  %v1326_v41 = vld [vmem:[%s2912_s7 + $0x78] sm:$0xff] }
 0x42d   :  { %1331 = vmatpush.msra.mxu0 %v1326_v41 }
 0x42e   :  { %1228 = vmatpush.msra.mxu3 %v2506_v49 }
 0x430   :  { %1229 = vmatpush.msra.mxu3 %v2519_v3  ;;  %v2976_v3 = vld [vmem:[#allocation24_spill] sm:$0xff] }
 0x432   :  { %1230 = vmatpush.msra.mxu3 %v2532_v34 }
 0x434   :  { %1231 = vmatpush.msra.mxu3 %v2545_v35  ;;  %v1325_v35 = vld [vmem:[%s2912_s7 + $0x70] sm:$0xff] }
 0x435   :  { %1332 = vmatpush.msra.mxu0 %v1325_v35  ;;  %v2857_v35 = vld [vmem:[%s2913_s8] ss:$0 sm:$0xff] }
 0x436   :  { %1232 = vmatpush.msra.mxu3 %v2558_v1  ;;  %v1324_v1 = vld [vmem:[%s2912_s7 + $0x68] sm:$0xff] }
 0x437   :  { %1333 = vmatpush.msra.mxu0 %v1324_v1  ;;  %v2979_v1 = vld [vmem:[#allocation26_spill] sm:$0xff] }
 0x438   :  { %1233 = vmatpush.msra.mxu3 %v2571_v48 }
 0x43a   :  { %1234 = vmatpush.msra.mxu3 %v2584_v58  ;;  %v1323_v58 = vld [vmem:[%s2912_s7 + $0x60] sm:$0xff] }
 0x43b   :  { %1334 = vmatpush.msra.mxu0 %v1323_v58 }
 0x43c   :  { %1235 = vmatpush.msra.mxu3 %v2690_v27  ;;  %v1322_v27 = vld [vmem:[%s2912_s7 + $0x58] sm:$0xff] }
 0x43d   :  { %1335 = vmatpush.msra.mxu0 %v1322_v27 }
 0x43e   :  { %1236 = vmatpush.msra.mxu3 %v2698_v43 }
 0x440   :  { %1237 = vmatpush.msra.mxu3 %v2706_v19  ;;  %v2977_v19 = vld [vmem:[#allocation23_spill] sm:$0xff] }
 0x442   :  { %1238 = vmatpush.msra.mxu3 %v2714_v12 }
 0x444   :  { %1239 = vmatpush.msra.mxu3 %v2722_v16  ;;  %v1321_v16 = vld [vmem:[%s2912_s7 + $0x50] sm:$0xff] }
 0x445   :  { %1336 = vmatpush.msra.mxu0 %v1321_v16 }
 0x446   :  { %1240 = vmatpush.msra.mxu3 %v2732_v20 }
 0x448   :  { %1241 = vmatpush.msra.mxu3 %v2742_v22  ;;  %v1320_v22 = vld [vmem:[%s2912_s7 + $0x48] sm:$0xff] }
 0x449   :  { %1337 = vmatpush.msra.mxu0 %v1320_v22 }
 0x44a   :  { %1242 = vmatpush.msra.mxu3 %v2752_v24  ;;  %v1319_v24 = vld [vmem:[%s2912_s7 + $0x40] sm:$0xff] }
 0x44b   :  { %1338 = vmatpush.msra.mxu0 %v1319_v24 }
 0x44d   :  { %1339 = vmatpush.msra.mxu0 %v1318_v25 }
 0x44f   :  { %1340 = vmatpush.msra.mxu0 %v1317_v46 }
 0x451   :  { %1341 = vmatpush.msra.mxu0 %v1316_v0 }
 0x453   :  { %1342 = vmatpush.msra.mxu0 %v1315_v36 }
 0x455   :  { %1343 = vmatpush.msra.mxu0 %v1314_v52 }
 0x457   :  { %1344 = vmatpush.msra.mxu0 %v1313_v62 }
 0x459   :  { %1345 = vmatpush.msra.mxu0 %v1312_v2 }
 0x45b   :  { %1346 = vmatpush.msra.mxu0 %v1311_v57 }
 0x4a8   :  { %v994_v49 = vpop.f32.mrf.mxu0 }
 0x4a9   :  { %v1024_v34 = vadd.f32 %v994_v49, %v2976_v3  ;;  %v1014_v5 = vpop.f32.mrf.mxu1 }
 0x4aa   :  { %v1063_v61 = vadd.f32 %v2838_v51, %v1014_v5 }
 0x4ab   :  { %v1414_v48 = vmul.f32 -1.442695, %v1024_v34 }
 0x4ad   :  { %1476 = vpow2.f32 %v1414_v48  ;;  %v2980_v48 = vld [vmem:[#allocation27_spill] sm:$0xff] }
 0x4ae   :  { %v974_v43 = vpop.f32.mrf.mxu3 }
 0x4af   :  { %v1023_v12 = vadd.f32 %v974_v43, %v2977_v19 }
 0x4b1   :  { %v1413_v20 = vmul.f32 -1.442695, %v1023_v12 }
 0x4b3   :  { %1478 = vpow2.f32 %v1413_v20  ;;  %v1477_v28 = vpop.eup %1476 }
 0x4b4   :  { %v1032_v8 = vadd.f32 1.0, %v1477_v28 }
 0x4b6   :  { %v1059_v29 = vand.u32 2147483648, %v1032_v8  ;;  %vm1053_vm14 = vweird.f32 %v1032_v8  ;;  %v1057_v40 = vand.u32 2147483647, %v1032_v8 }
 0x4b8   :  { %v1060_v37 = vor.u32 1.1754944e-38, %v1059_v29  ;;  %vm1058_vm0 = vcmp.eq.f32.partialorder %v1057_v40, 8.507059e+37 }
 0x4b9   :  { %v1479_v18 = vpop.eup %1478 }
 0x4ba   :  { %v1031_v63 = vadd.f32 1.0, %v1479_v18 }
 0x4bc   :  { %1480 = vrcp.f32 %v1031_v63  ;;  %v1044_v45 = vand.u32 2147483648, %v1031_v63  ;;  %v1042_v6 = vand.u32 2147483647, %v1031_v63  ;;  %vm1038_vm10 = vweird.f32 %v1031_v63 }
 0x4bd   :  { %1482 = vrcp.f32 %v1032_v8 }
 0x4be   :  { %v1045_v14 = vor.u32 1.1754944e-38, %v1044_v45  ;;  %vm1043_vm12 = vcmp.eq.f32.partialorder %v1042_v6, 8.507059e+37 }
 0x4c2   :  { %v1481_v15 = vpop.eup %1480 }
 0x4c3   :  { %v1483_v47 = vpop.eup %1482  ;;  %v1034_v50 = vmul.f32 %v1481_v15, %v1031_v63  ;;  %vm1039_vm9 = vweird.f32 %v1481_v15 }
 0x4c4   :  { %v1049_v56 = vmul.f32 %v1483_v47, %v1032_v8  ;;  %vm1040_vm11 = vmor %vm1038_vm10, %vm1039_vm9  ;;  %vm1054_vm13 = vweird.f32 %v1483_v47 }
 0x4c5   :  { %v1035_v60 = vsub.f32 1.0, %v1034_v50  ;;  %vm1055_vm15 = vmor %vm1053_vm14, %vm1054_vm13 }
 0x4c6   :  { %v1050_v10 = vsub.f32 1.0, %v1049_v56 }
 0x4c7   :  { %v1036_v32 = vmul.f32 %v1481_v15, %v1035_v60 }
 0x4c8   :  { %v1051_v13 = vmul.f32 %v1483_v47, %v1050_v10 }
 0x4c9   :  { %v1037_v7 = vadd.f32 %v1481_v15, %v1036_v32  ;;  %v2981_v32 = vld [vmem:[#allocation28_spill] sm:$0xff] }
 0x4ca   :  { %v1052_v30 = vadd.f32 %v1483_v47, %v1051_v13 }
 0x4cb   :  { %v1041_v54 = vsel %vm1040_vm11, %v1481_v15, %v1037_v7 }
 0x4cc   :  { %v1046_v26 = vsel %vm1043_vm12, %v1045_v14, %v1041_v54  ;;  %v1056_v59 = vsel %vm1055_vm15, %v1483_v47, %v1052_v30 }
 0x4cd   :  { %v1064_v11 = vmul.f32 %v1063_v61, %v1046_v26  ;;  %v1061_v21 = vsel %vm1058_vm0, %v1060_v37, %v1056_v59 }
 0x4cf   :  { %v1065_v9 = vadd.f32 %v1064_v11, %v2978_v33 }
 0x4d1   :  { %1484 = vtanh.f32 %v1065_v9 }
 0x4d7   :  { %v1485_v31 = vpop.eup %1484 }
 0x4d8   :  { %v1067_v17 = vsub.f32 %v2764_v23, %v1485_v31 }
 0x4da   :  { %v1068_v55 = vmul.f32 %v1067_v17, %v1061_v21 }
 0x4dc   :  { %v2843_v41 = vadd.f32 %v1485_v31, %v1068_v55  ;;  %v2982_v31 = vld [vmem:[#allocation29_spill] sm:$0xff] }
 0x4de   :  { %1088 = vmatmul.f32.vlgmr.msra.gmra.mxu2 %v2843_v41  ;;  %1108 = vmatmul.f32.vlgmr.msrb.gmra.mxu3 %v2843_v41 }
 0x4df   :  { %1128 = vmatmul.f32.vlgmr.msrb.gmra.mxu0 %v2843_v41 }
 0x4e7   :  { %1347 = vmatmul.f32.vlgmr.msra.gmra.mxu0 %v2302_v53 }
 0x4ef   :  { %1350 = vmatmul.f32.gmra.mxu0 %v2362_v4 }
 0x4f7   :  { %1353 = vmatmul.f32.gmra.mxu0 %v2485_v39 }
 0x4ff   :  { %1356 = vmatmul.f32.gmra.mxu0 %v2658_v38 }
 0x507   :  { %1359 = vmatmul.f32.gmra.mxu0 %v2764_v23 }
 0x50f   :  { %1362 = vmatmul.f32.gmra.mxu0 %v2843_v41 }
 0x55c   :  { %v1129_v49 = vpop.f32.mrf.mxu0 }
 0x55d   :  { %v1178_v50 = vadd.f32 %v2838_v51, %v1129_v49  ;;  %v2983_v49 = vld [vmem:[#allocation30_spill] sm:$0xff] }
 0x561   :  { %v1089_v3 = vpop.f32.mrf.mxu2  ;;  %v1109_v34 = vpop.f32.mrf.mxu3 }
 0x562   :  { %v1138_v53 = vadd.f32 %v1089_v3, %v2979_v1  ;;  %v1139_v4 = vadd.f32 %v1109_v34, %v2980_v48 }
 0x564   :  { %v1415_v58 = vmul.f32 -1.442695, %v1138_v53  ;;  %v1416_v39 = vmul.f32 -1.442695, %v1139_v4  ;;  %v1348_v27 = vpop.f32.mrf.mxu0 }
 0x565   :  { %v1349_v38 = vadd.f32 %v2857_v35, %v1348_v27 }
 0x566   :  { %1486 = vpow2.f32 %v1415_v58 }
 0x567   :  { %1488 = vpow2.f32 %v1416_v39  ;;  %1372 = vst [vmem:[%s2914_s10] sm:$0xff] %v1349_v38 }
 0x56c   :  { %v1487_v23 = vpop.eup %1486  ;;  %v1351_v43 = vpop.f32.mrf.mxu0 }
 0x56d   :  { %v1489_v19 = vpop.eup %1488  ;;  %v1146_v12 = vadd.f32 1.0, %v1487_v23  ;;  %v1352_v16 = vadd.f32 %v2857_v35, %v1351_v43 }
 0x56e   :  { %v1147_v20 = vadd.f32 1.0, %v1489_v19 }
 0x56f   :  { %1490 = vrcp.f32 %v1146_v12  ;;  %1373 = vst [vmem:[%s2914_s10 + $0x8] sm:$0xff] %v1352_v16  ;;  %v1159_v8 = vand.u32 2147483648, %v1146_v12  ;;  %v1157_v36 = vand.u32 2147483647, %v1146_v12  ;;  %vm1153_vm2 = vweird.f32 %v1146_v12 }
 0x570   :  { %1492 = vrcp.f32 %v1147_v20  ;;  %v1174_v14 = vand.u32 2147483648, %v1147_v20  ;;  %vm1168_vm6 = vweird.f32 %v1147_v20  ;;  %v1172_v61 = vand.u32 2147483647, %v1147_v20 }
 0x571   :  { %v1160_v2 = vor.u32 1.1754944e-38, %v1159_v8  ;;  %vm1158_vm4 = vcmp.eq.f32.partialorder %v1157_v36, 8.507059e+37 }
 0x572   :  { %v1175_v11 = vor.u32 1.1754944e-38, %v1174_v14  ;;  %vm1173_vm8 = vcmp.eq.f32.partialorder %v1172_v61, 8.507059e+37 }
 0x574   :  { %v1354_v22 = vpop.f32.mrf.mxu0 }
 0x575   :  { %v1491_v24 = vpop.eup %1490  ;;  %v1355_v25 = vadd.f32 %v2857_v35, %v1354_v22 }
 0x576   :  { %v1493_v28 = vpop.eup %1492  ;;  %v1149_v46 = vmul.f32 %v1491_v24, %v1146_v12  ;;  %vm1154_vm1 = vweird.f32 %v1491_v24 }
 0x577   :  { %1374 = vst [vmem:[%s2914_s10 + $0x10] sm:$0xff] %v1355_v25  ;;  %v1164_v0 = vmul.f32 %v1493_v28, %v1147_v20  ;;  %vm1155_vm3 = vmor %vm1153_vm2, %vm1154_vm1  ;;  %vm1169_vm5 = vweird.f32 %v1493_v28 }
 0x578   :  { %v1150_v18 = vsub.f32 1.0, %v1149_v46  ;;  %vm1170_vm7 = vmor %vm1168_vm6, %vm1169_vm5 }
 0x579   :  { %v1165_v15 = vsub.f32 1.0, %v1164_v0 }
 0x57a   :  { %v1151_v63 = vmul.f32 %v1491_v24, %v1150_v18  ;;  %v304_v18 = vadd.f32 %v2355_v44, %v2247_v42 }
 0x57b   :  { %v1166_v45 = vmul.f32 %v1493_v28, %v1165_v15 }
 0x57c   :  { %v1152_v52 = vadd.f32 %v1491_v24, %v1151_v63  ;;  %v1357_v62 = vpop.f32.mrf.mxu0 }
 0x57d   :  { %v1358_v47 = vadd.f32 %v2857_v35, %v1357_v62  ;;  %v1167_v7 = vadd.f32 %v1493_v28, %v1166_v45 }
 0x57e   :  { %v1156_v57 = vsel %vm1155_vm3, %v1491_v24, %v1152_v52 }
 0x57f   :  { %v1161_v60 = vsel %vm1158_vm4, %v1160_v2, %v1156_v57  ;;  %1375 = vst [vmem:[%s2914_s10 + $0x18] sm:$0xff] %v1358_v47  ;;  %v1171_v54 = vsel %vm1170_vm7, %v1493_v28, %v1167_v7 }
 0x580   :  { %v1179_v56 = vmul.f32 %v1178_v50, %v1161_v60  ;;  %v1176_v9 = vsel %vm1173_vm8, %v1175_v11, %v1171_v54 }
 0x582   :  { %v1180_v6 = vadd.f32 %v1179_v56, %v2981_v32 }
 0x584   :  { %v1360_v5 = vpop.f32.mrf.mxu0  ;;  %1494 = vtanh.f32 %v1180_v6 }
 0x585   :  { %v1361_v10 = vadd.f32 %v2857_v35, %v1360_v5 }
 0x587   :  { %1376 = vst [vmem:[%s2914_s10 + $0x20] sm:$0xff] %v1361_v10 }
 0x58a   :  { %v1495_v26 = vpop.eup %1494 }
 0x58b   :  { %v1182_v13 = vsub.f32 %v2843_v41, %v1495_v26 }
 0x58c   :  { %v1363_v33 = vpop.f32.mrf.mxu0 }
 0x58d   :  { %v1364_v30 = vadd.f32 %v2857_v35, %v1363_v33  ;;  %v1183_v29 = vmul.f32 %v1182_v13, %v1176_v9 }
 0x58f   :  { %1377 = vst [vmem:[%s2914_s10 + $0x28] sm:$0xff] %v1364_v30  ;;  %v1184_v40 = vadd.f32 %v1495_v26, %v1183_v29 }
 0x591   :  { %1203 = vmatmul.f32.vlgmr.msrb.gmra.mxu1 %v1184_v40  ;;  %1223 = vmatmul.f32.vlgmr.msrb.gmra.mxu2 %v1184_v40 }
 0x592   :  { %1243 = vmatmul.f32.vlgmr.msra.gmra.mxu3 %v1184_v40  ;;  %1365 = vmatmul.f32.gmra.mxu0 %v1184_v40 }
 0x60e   :  { %v1204_v59 = vpop.f32.mrf.mxu1 }
 0x60f   :  { %v1253_v37 = vadd.f32 %v1204_v59, %v2982_v31  ;;  %v1366_v17 = vpop.f32.mrf.mxu0 }
 0x610   :  { %v1367_v21 = vadd.f32 %v2857_v35, %v1366_v17 }
 0x611   :  { %v1417_v55 = vmul.f32 -1.442695, %v1253_v37 }
 0x612   :  { %1378 = vst [vmem:[%s2914_s10 + $0x30] sm:$0xff] %v1367_v21 }
 0x613   :  { %1496 = vpow2.f32 %v1417_v55 }
 0x614   :  { %v1224_v41 = vpop.f32.mrf.mxu2 }
 0x615   :  { %v1254_v3 = vadd.f32 %v1224_v41, %v2983_v49  ;;  %v1244_v12 = vpop.f32.mrf.mxu3 }
 0x616   :  { %v1293_v25 = vadd.f32 %v2838_v51, %v1244_v12 }
 0x617   :  { %v1418_v34 = vmul.f32 -1.442695, %v1254_v3 }
 0x619   :  { %v1497_v1 = vpop.eup %1496  ;;  %1498 = vpow2.f32 %v1418_v34 }
 0x61a   :  { %v1261_v53 = vadd.f32 1.0, %v1497_v1 }
 0x61c   :  { %1500 = vrcp.f32 %v1261_v53  ;;  %v1274_v38 = vand.u32 2147483648, %v1261_v53  ;;  %v1272_v43 = vand.u32 2147483647, %v1261_v53  ;;  %vm1268_vm10 = vweird.f32 %v1261_v53 }
 0x61e   :  { %v1275_v22 = vor.u32 1.1754944e-38, %v1274_v38  ;;  %vm1273_vm12 = vcmp.eq.f32.partialorder %v1272_v43, 8.507059e+37 }
 0x61f   :  { %v1499_v48 = vpop.eup %1498 }
 0x620   :  { %v1262_v4 = vadd.f32 1.0, %v1499_v48 }
 0x622   :  { %v1501_v58 = vpop.eup %1500  ;;  %1502 = vrcp.f32 %v1262_v4  ;;  %v1289_v52 = vand.u32 2147483648, %v1262_v4  ;;  %vm1283_vm14 = vweird.f32 %v1262_v4  ;;  %v1287_v62 = vand.u32 2147483647, %v1262_v4 }
 0x623   :  { %v1264_v39 = vmul.f32 %v1501_v58, %v1261_v53  ;;  %vm1269_vm9 = vweird.f32 %v1501_v58 }
 0x624   :  { %vm1270_vm11 = vmor %vm1268_vm10, %vm1269_vm9  ;;  %v1290_v47 = vor.u32 1.1754944e-38, %v1289_v52  ;;  %vm1288_vm0 = vcmp.eq.f32.partialorder %v1287_v62, 8.507059e+37 }
 0x625   :  { %v1265_v27 = vsub.f32 1.0, %v1264_v39 }
 0x627   :  { %v1266_v23 = vmul.f32 %v1501_v58, %v1265_v27 }
 0x628   :  { %v1503_v19 = vpop.eup %1502 }
 0x629   :  { %v1267_v16 = vadd.f32 %v1501_v58, %v1266_v23  ;;  %v1279_v20 = vmul.f32 %v1503_v19, %v1262_v4  ;;  %vm1284_vm13 = vweird.f32 %v1503_v19 }
 0x62a   :  { %vm1285_vm15 = vmor %vm1283_vm14, %vm1284_vm13 }
 0x62b   :  { %v1271_v24 = vsel %vm1270_vm11, %v1501_v58, %v1267_v16  ;;  %v1280_v28 = vsub.f32 1.0, %v1279_v20 }
 0x62c   :  { %v1276_v46 = vsel %vm1273_vm12, %v1275_v22, %v1271_v24 }
 0x62d   :  { %v1294_v8 = vmul.f32 %v1293_v25, %v1276_v46  ;;  %v1281_v0 = vmul.f32 %v1503_v19, %v1280_v28 }
 0x62f   :  { %v1295_v63 = vadd.f32 %v1294_v8, %v304_v18  ;;  %v1282_v36 = vadd.f32 %v1503_v19, %v1281_v0 }
 0x631   :  { %1504 = vtanh.f32 %v1295_v63  ;;  %v1286_v2 = vsel %vm1285_vm15, %v1503_v19, %v1282_v36 }
 0x632   :  { %v1291_v50 = vsel %vm1288_vm0, %v1290_v47, %v1286_v2 }
 0x637   :  { %v1505_v15 = vpop.eup %1504 }
 0x638   :  { %v1297_v51 = vsub.f32 %v1184_v40, %v1505_v15 }
 0x63a   :  { %v1298_v57 = vmul.f32 %v1297_v51, %v1291_v50 }
 0x63c   :  { %v1299_v60 = vadd.f32 %v1505_v15, %v1298_v57 }
 0x63e   :  { %1302 = vst [vmem:[%s2915_s11] sm:$0xff] %v1299_v60  ;;  %1368 = vmatmul.f32.gmra.mxu0 %v1299_v60 }
 0x6bb   :  { %v1369_v42 = vpop.f32.mrf.mxu0 }
 0x6bc   :  { %v1370_v44 = vadd.f32 %v2857_v35, %v1369_v42 }
 0x6be   :  { %1379 = vst [vmem:[%s2914_s10 + $0x38] sm:$0xff] %v1370_v44 }

</bundles_post_ra>
